<compile_context>
chip_gen: v7x
topology: tpu7x:2x2x1
jax: 0.10.0
libtpu: 0.0.40
codegen_flags: <defaults>
</compile_context>

<pallas_src>
import functools

import jax
import jax.numpy as jnp
from jax import lax
from jax.experimental import pallas as pl
from jax.experimental.pallas import tpu as pltpu


# -----------------------------------------------------------------------------
# Fused kernel: all encoder layers in one invocation, activation carried as a
# fori_loop value, whole stacked weight set VMEM-resident.
# -----------------------------------------------------------------------------
def fused_encoder_kernel(
    x_ref,       # (S, E)      f32  embedding output
    wqkv_ref,    # (L, E, 3E)  bf16 packed Q|K|V projection (Q pre-scaled)
    wo_ref,      # (L, E, E)   bf16 fc_out weight
    w1_ref,      # (L, E, F)   bf16 FFN first linear
    w2_ref,      # (L, F, E)   bf16 FFN second linear
    vecs_ref,    # (L, 6, E)   f32  rows: bo, g1, c1, d2, g2, c2
    d1_ref,      # (L, 1, F)   f32  FFN first bias
    o_ref,       # (S, E)      f32  output
    *,
    embed_size: int,
    heads: int,
    num_layers: int,
):
    E = embed_size
    H = heads
    Dh = E // H

    def layer_body(l, x):
        # x: (S, E) f32 activation carried across layers.
        x_bf = x.astype(jnp.bfloat16)

        wqkv = wqkv_ref[l]                      # (E, 3E) bf16
        wo = wo_ref[l]                          # (E, E)  bf16
        w1 = w1_ref[l]                          # (E, F)  bf16
        w2 = w2_ref[l]                          # (F, E)  bf16
        vec = vecs_ref[l]                       # (6, E)  f32
        d1 = d1_ref[l]                          # (1, F)  f32
        bo, g1, c1 = vec[0:1, :], vec[1:2, :], vec[2:3, :]
        d2, g2, c2 = vec[3:4, :], vec[4:5, :], vec[5:6, :]

        # --- fused QKV projection: one lane-dense MXU matmul ---------------
        qkv = jnp.dot(x_bf, wqkv, preferred_element_type=jnp.float32)  # (S, 3E)

        # --- per-head attention (slices only the small activation value) ---
        ctx_heads = []
        for h in range(H):
            qh = qkv[:, h * Dh:(h + 1) * Dh].astype(jnp.bfloat16)           # (S, Dh)
            kh = qkv[:, E + h * Dh:E + (h + 1) * Dh].astype(jnp.bfloat16)   # (S, Dh)
            vh = qkv[:, 2 * E + h * Dh:2 * E + (h + 1) * Dh].astype(jnp.bfloat16)

            # q @ k^T without materializing a transpose (contract last axes).
            energy = lax.dot_general(qh, kh, (((1,), (1,)), ((), ())),
                                     preferred_element_type=jnp.float32)    # (S, S)
            energy = energy - jnp.max(energy, axis=-1, keepdims=True)
            p = jnp.exp(energy)
            p = p * pl.reciprocal(jnp.sum(p, axis=-1, keepdims=True), approx=True)

            ctx_heads.append(jnp.dot(p.astype(jnp.bfloat16), vh,
                                     preferred_element_type=jnp.float32))   # (S, Dh)

        ctx = jnp.concatenate(ctx_heads, axis=-1)                            # (S, E)
        attn = jnp.dot(ctx.astype(jnp.bfloat16), wo,
                       preferred_element_type=jnp.float32) + bo              # (S, E)

        # --- residual + LayerNorm1 (f32 elementwise) ------------------------
        h1 = attn + x
        mu1 = jnp.mean(h1, axis=-1, keepdims=True)
        var1 = jnp.mean(jnp.square(h1 - mu1), axis=-1, keepdims=True)
        xln = (h1 - mu1) * lax.rsqrt(var1 + 1e-5)
        xln = xln * g1 + c1

        # --- FFN: Linear -> ReLU -> Linear (bf16 matmuls, f32 accumulate) ---
        f = jnp.dot(xln.astype(jnp.bfloat16), w1,
                    preferred_element_type=jnp.float32) + d1
        f = jnp.maximum(f, 0.0)
        f = jnp.dot(f.astype(jnp.bfloat16), w2,
                    preferred_element_type=jnp.float32) + d2

        # --- residual + LayerNorm2 ------------------------------------------
        h2 = f + xln
        mu2 = jnp.mean(h2, axis=-1, keepdims=True)
        var2 = jnp.mean(jnp.square(h2 - mu2), axis=-1, keepdims=True)
        out = (h2 - mu2) * lax.rsqrt(var2 + 1e-5)
        out = out * g2 + c2
        return out

    x0 = x_ref[...].astype(jnp.float32)
    out = lax.fori_loop(0, num_layers, layer_body, x0, unroll=True)
    o_ref[...] = out.astype(o_ref.dtype)


# -----------------------------------------------------------------------------
# Wrapper: single pallas_call, whole arrays VMEM-resident (no grid needed —
# the complete stacked weight set is tiny relative to VMEM).
# -----------------------------------------------------------------------------
def transformer_encoder(feature_seq, embedding_table, packed_params,
                        *, embed_size, heads):
    wqkv, wo, w1, w2, vecs, d1 = packed_params
    num_layers = wqkv.shape[0]

    # Embedding lookup (gather) + dropout(identity, eval mode) as JAX glue.
    # TODO(synk): fuse the gather in-kernel (scalar-prefetch row gather) once it
    # matters; at (S=8, E=32) it is negligible.
    x = jnp.take(embedding_table, feature_seq, axis=0).astype(jnp.float32)   # (S, E)
    S = x.shape[0]

    kernel = functools.partial(fused_encoder_kernel, embed_size=embed_size,
                               heads=heads, num_layers=num_layers)
    vmem = pl.BlockSpec(memory_space=pltpu.MemorySpace.VMEM)

    return pl.pallas_call(
        kernel,
        out_shape=jax.ShapeDtypeStruct((S, embed_size), jnp.float32),
        in_specs=[vmem] * 7,
        out_specs=vmem,
        compiler_params=pltpu.CompilerParams(
            vmem_limit_bytes=64 * 1024 * 1024,
        ),
    )(x, wqkv, wo, w1, w2, vecs, d1)


# -----------------------------------------------------------------------------
# Deterministic synthetic parameters, stacked across layers, QKV fused, small
# vectors packed into one slab per layer.
# -----------------------------------------------------------------------------
def init_stacked_params(key, num_layers, embed_size, heads, forward_expansion):
    E = embed_size
    F = forward_expansion * E
    L = num_layers
    scale = 0.05
    ks = jax.random.split(key, 8)

    def lin(k, shape):
        return (scale * jax.random.normal(k, shape)).astype(jnp.float32)

    # Fold the 1/sqrt(embed_size) attention scale into the Q projection.
    wq = lin(ks[0], (L, E, E)) * (1.0 / (float(E) ** 0.5))
    wk = lin(ks[1], (L, E, E))
    wv = lin(ks[2], (L, E, E))
    wo = lin(ks[3], (L, E, E))
    bo = lin(ks[4], (L, E))
    w1 = lin(ks[5], (L, E, F))
    d1 = lin(ks[6], (L, 1, F))
    w2 = lin(ks[7], (L, F, E))
    d2 = jnp.zeros((L, E), jnp.float32)
    g1 = jnp.ones((L, E), jnp.float32)
    c1 = jnp.zeros((L, E), jnp.float32)
    g2 = jnp.ones((L, E), jnp.float32)
    c2 = jnp.zeros((L, E), jnp.float32)

    # Packed QKV (head h of q/k/v = columns h*Dh:(h+1)*Dh of each E-wide block).
    wqkv = jnp.concatenate([wq, wk, wv], axis=-1).astype(jnp.bfloat16)   # (L, E, 3E)
    # Pack the six small E-wide vectors into one slab per layer.
    vecs = jnp.stack([bo, g1, c1, d2, g2, c2], axis=1)                   # (L, 6, E)

    return (wqkv, wo.astype(jnp.bfloat16), w1.astype(jnp.bfloat16),
            w2.astype(jnp.bfloat16), vecs, d1)


if __name__ == "__main__":
    # Small config consistent with the module's forward (single sequence).
    vocab_size = 64
    seq_len = 8
    embed_size = 32
    num_heads = 4
    num_layers = 2
    forward_expansion = 2

    key = jax.random.PRNGKey(0)
    k_emb, k_seq, k_layers = jax.random.split(key, 3)

    embedding_table = (0.05 * jax.random.normal(
        k_emb, (vocab_size, embed_size))).astype(jnp.float32)
    feature_seq = jax.random.randint(k_seq, (seq_len,), 0, vocab_size)

    packed_params = init_stacked_params(
        k_layers, num_layers, embed_size, num_heads, forward_expansion)

    out = transformer_encoder(
        feature_seq, embedding_table, packed_params,
        embed_size=embed_size, heads=num_heads,
    )
    out = jax.block_until_ready(out)
    assert out.shape == (seq_len, embed_size)
    assert bool(jnp.all(jnp.isfinite(out)))
    print("KERNEL_OK")
</pallas_src>

<mosaic_0001>
module attributes {stable_mosaic.version = 11 : i64} {
  func.func @fused_encoder_kernel(%arg0: memref<8x32xf32, #tpu.memory_space<vmem>>, %arg1: memref<2x32x96xbf16, #tpu.memory_space<vmem>>, %arg2: memref<2x32x32xbf16, #tpu.memory_space<vmem>>, %arg3: memref<2x32x64xbf16, #tpu.memory_space<vmem>>, %arg4: memref<2x64x32xbf16, #tpu.memory_space<vmem>>, %arg5: memref<2x6x32xf32, #tpu.memory_space<vmem>>, %arg6: memref<2x1x64xf32, #tpu.memory_space<vmem>>, %arg7: memref<8x32xf32, #tpu.memory_space<vmem>>) attributes {dimension_semantics = [], scalar_prefetch = 0 : i64, scratch_operands = 0 : i64, tpu.core_type = #tpu.core_type<tc>} {
    %c0 = arith.constant 0 : index
    %c0_0 = arith.constant 0 : index
    %0 = vector.load %arg0[%c0, %c0_0] : memref<8x32xf32, #tpu.memory_space<vmem>>, vector<8x32xf32>
    %c0_i32 = arith.constant 0 : i32
    %1 = arith.truncf %0 : vector<8x32xf32> to vector<8x32xbf16>
    %2 = arith.index_cast %c0_i32 : i32 to index
    %c0_1 = arith.constant 0 : index
    %c0_2 = arith.constant 0 : index
    %3 = vector.load %arg1[%2, %c0_1, %c0_2] : memref<2x32x96xbf16, #tpu.memory_space<vmem>>, vector<1x32x96xbf16>
    %4 = vector.shape_cast %3 : vector<1x32x96xbf16> to vector<32x96xbf16>
    %5 = arith.index_cast %c0_i32 : i32 to index
    %c0_3 = arith.constant 0 : index
    %c0_4 = arith.constant 0 : index
    %6 = vector.load %arg2[%5, %c0_3, %c0_4] : memref<2x32x32xbf16, #tpu.memory_space<vmem>>, vector<1x32x32xbf16>
    %7 = vector.shape_cast %6 : vector<1x32x32xbf16> to vector<32x32xbf16>
    %8 = arith.index_cast %c0_i32 : i32 to index
    %c0_5 = arith.constant 0 : index
    %c0_6 = arith.constant 0 : index
    %9 = vector.load %arg3[%8, %c0_5, %c0_6] : memref<2x32x64xbf16, #tpu.memory_space<vmem>>, vector<1x32x64xbf16>
    %10 = vector.shape_cast %9 : vector<1x32x64xbf16> to vector<32x64xbf16>
    %11 = arith.index_cast %c0_i32 : i32 to index
    %c0_7 = arith.constant 0 : index
    %c0_8 = arith.constant 0 : index
    %12 = vector.load %arg4[%11, %c0_7, %c0_8] : memref<2x64x32xbf16, #tpu.memory_space<vmem>>, vector<1x64x32xbf16>
    %13 = vector.shape_cast %12 : vector<1x64x32xbf16> to vector<64x32xbf16>
    %14 = arith.index_cast %c0_i32 : i32 to index
    %c0_9 = arith.constant 0 : index
    %c0_10 = arith.constant 0 : index
    %15 = vector.load %arg5[%14, %c0_9, %c0_10] : memref<2x6x32xf32, #tpu.memory_space<vmem>>, vector<1x6x32xf32>
    %16 = vector.shape_cast %15 : vector<1x6x32xf32> to vector<6x32xf32>
    %17 = arith.index_cast %c0_i32 : i32 to index
    %c0_11 = arith.constant 0 : index
    %c0_12 = arith.constant 0 : index
    %18 = vector.load %arg6[%17, %c0_11, %c0_12] : memref<2x1x64xf32, #tpu.memory_space<vmem>>, vector<1x1x64xf32>
    %19 = vector.shape_cast %18 : vector<1x1x64xf32> to vector<1x64xf32>
    %20 = vector.extract_strided_slice %16 {offsets = [0, 0], sizes = [1, 32], strides = [1, 1]} : vector<6x32xf32> to vector<1x32xf32>
    %21 = vector.extract_strided_slice %16 {offsets = [1, 0], sizes = [1, 32], strides = [1, 1]} : vector<6x32xf32> to vector<1x32xf32>
    %22 = vector.extract_strided_slice %16 {offsets = [2, 0], sizes = [1, 32], strides = [1, 1]} : vector<6x32xf32> to vector<1x32xf32>
    %23 = vector.extract_strided_slice %16 {offsets = [3, 0], sizes = [1, 32], strides = [1, 1]} : vector<6x32xf32> to vector<1x32xf32>
    %24 = vector.extract_strided_slice %16 {offsets = [4, 0], sizes = [1, 32], strides = [1, 1]} : vector<6x32xf32> to vector<1x32xf32>
    %25 = vector.extract_strided_slice %16 {offsets = [5, 0], sizes = [1, 32], strides = [1, 1]} : vector<6x32xf32> to vector<1x32xf32>
    %cst = arith.constant dense<0.000000e+00> : vector<8x96xf32>
    %26 = tpu.matmul %1, %4, %cst {dimension_numbers = #tpu.dot_dimension_numbers<[1], [0], [0], [1], [0, 0, 1, 1], [], []>} : vector<8x32xbf16>, vector<32x96xbf16>, vector<8x96xf32> -> vector<8x96xf32>
    %27 = vector.extract_strided_slice %26 {offsets = [0, 0], sizes = [8, 8], strides = [1, 1]} : vector<8x96xf32> to vector<8x8xf32>
    %28 = arith.truncf %27 : vector<8x8xf32> to vector<8x8xbf16>
    %29 = vector.extract_strided_slice %26 {offsets = [0, 32], sizes = [8, 8], strides = [1, 1]} : vector<8x96xf32> to vector<8x8xf32>
    %30 = arith.truncf %29 : vector<8x8xf32> to vector<8x8xbf16>
    %31 = vector.extract_strided_slice %26 {offsets = [0, 64], sizes = [8, 8], strides = [1, 1]} : vector<8x96xf32> to vector<8x8xf32>
    %32 = arith.truncf %31 : vector<8x8xf32> to vector<8x8xbf16>
    %cst_13 = arith.constant dense<0.000000e+00> : vector<8x8xf32>
    %33 = tpu.matmul %28, %30, %cst_13 {dimension_numbers = #tpu.dot_dimension_numbers<[1], [1], [0], [0], [0, 0, 1, 0], [], []>} : vector<8x8xbf16>, vector<8x8xbf16>, vector<8x8xf32> -> vector<8x8xf32>
    %cst_14 = arith.constant dense<0xFF800000> : vector<8xf32>
    %34 = vector.multi_reduction <maximumf>, %33, %cst_14 [1] : vector<8x8xf32> to vector<8xf32>
    %35 = vector.shape_cast %34 : vector<8xf32> to vector<8x1xf32>
    %36 = vector.broadcast %35 : vector<8x1xf32> to vector<8x8xf32>
    %37 = arith.subf %33, %36 : vector<8x8xf32>
    %38 = math.exp %37 : vector<8x8xf32>
    %cst_15 = arith.constant dense<0.000000e+00> : vector<8xf32>
    %39 = vector.multi_reduction <add>, %38, %cst_15 [1] : vector<8x8xf32> to vector<8xf32>
    %40 = vector.shape_cast %39 : vector<8xf32> to vector<8x1xf32>
    %41 = tpu.reciprocal %40 {approx = true} : vector<8x1xf32> -> vector<8x1xf32>
    %42 = vector.broadcast %41 : vector<8x1xf32> to vector<8x8xf32>
    %43 = arith.mulf %38, %42 : vector<8x8xf32>
    %44 = arith.truncf %43 : vector<8x8xf32> to vector<8x8xbf16>
    %cst_16 = arith.constant dense<0.000000e+00> : vector<8x8xf32>
    %45 = tpu.matmul %44, %32, %cst_16 {dimension_numbers = #tpu.dot_dimension_numbers<[1], [0], [0], [1], [0, 0, 1, 1], [], []>} : vector<8x8xbf16>, vector<8x8xbf16>, vector<8x8xf32> -> vector<8x8xf32>
    %46 = vector.extract_strided_slice %26 {offsets = [0, 8], sizes = [8, 8], strides = [1, 1]} : vector<8x96xf32> to vector<8x8xf32>
    %47 = arith.truncf %46 : vector<8x8xf32> to vector<8x8xbf16>
    %48 = vector.extract_strided_slice %26 {offsets = [0, 40], sizes = [8, 8], strides = [1, 1]} : vector<8x96xf32> to vector<8x8xf32>
    %49 = arith.truncf %48 : vector<8x8xf32> to vector<8x8xbf16>
    %50 = vector.extract_strided_slice %26 {offsets = [0, 72], sizes = [8, 8], strides = [1, 1]} : vector<8x96xf32> to vector<8x8xf32>
    %51 = arith.truncf %50 : vector<8x8xf32> to vector<8x8xbf16>
    %cst_17 = arith.constant dense<0.000000e+00> : vector<8x8xf32>
    %52 = tpu.matmul %47, %49, %cst_17 {dimension_numbers = #tpu.dot_dimension_numbers<[1], [1], [0], [0], [0, 0, 1, 0], [], []>} : vector<8x8xbf16>, vector<8x8xbf16>, vector<8x8xf32> -> vector<8x8xf32>
    %cst_18 = arith.constant dense<0xFF800000> : vector<8xf32>
    %53 = vector.multi_reduction <maximumf>, %52, %cst_18 [1] : vector<8x8xf32> to vector<8xf32>
    %54 = vector.shape_cast %53 : vector<8xf32> to vector<8x1xf32>
    %55 = vector.broadcast %54 : vector<8x1xf32> to vector<8x8xf32>
    %56 = arith.subf %52, %55 : vector<8x8xf32>
    %57 = math.exp %56 : vector<8x8xf32>
    %cst_19 = arith.constant dense<0.000000e+00> : vector<8xf32>
    %58 = vector.multi_reduction <add>, %57, %cst_19 [1] : vector<8x8xf32> to vector<8xf32>
    %59 = vector.shape_cast %58 : vector<8xf32> to vector<8x1xf32>
    %60 = tpu.reciprocal %59 {approx = true} : vector<8x1xf32> -> vector<8x1xf32>
    %61 = vector.broadcast %60 : vector<8x1xf32> to vector<8x8xf32>
    %62 = arith.mulf %57, %61 : vector<8x8xf32>
    %63 = arith.truncf %62 : vector<8x8xf32> to vector<8x8xbf16>
    %cst_20 = arith.constant dense<0.000000e+00> : vector<8x8xf32>
    %64 = tpu.matmul %63, %51, %cst_20 {dimension_numbers = #tpu.dot_dimension_numbers<[1], [0], [0], [1], [0, 0, 1, 1], [], []>} : vector<8x8xbf16>, vector<8x8xbf16>, vector<8x8xf32> -> vector<8x8xf32>
    %65 = vector.extract_strided_slice %26 {offsets = [0, 16], sizes = [8, 8], strides = [1, 1]} : vector<8x96xf32> to vector<8x8xf32>
    %66 = arith.truncf %65 : vector<8x8xf32> to vector<8x8xbf16>
    %67 = vector.extract_strided_slice %26 {offsets = [0, 48], sizes = [8, 8], strides = [1, 1]} : vector<8x96xf32> to vector<8x8xf32>
    %68 = arith.truncf %67 : vector<8x8xf32> to vector<8x8xbf16>
    %69 = vector.extract_strided_slice %26 {offsets = [0, 80], sizes = [8, 8], strides = [1, 1]} : vector<8x96xf32> to vector<8x8xf32>
    %70 = arith.truncf %69 : vector<8x8xf32> to vector<8x8xbf16>
    %cst_21 = arith.constant dense<0.000000e+00> : vector<8x8xf32>
    %71 = tpu.matmul %66, %68, %cst_21 {dimension_numbers = #tpu.dot_dimension_numbers<[1], [1], [0], [0], [0, 0, 1, 0], [], []>} : vector<8x8xbf16>, vector<8x8xbf16>, vector<8x8xf32> -> vector<8x8xf32>
    %cst_22 = arith.constant dense<0xFF800000> : vector<8xf32>
    %72 = vector.multi_reduction <maximumf>, %71, %cst_22 [1] : vector<8x8xf32> to vector<8xf32>
    %73 = vector.shape_cast %72 : vector<8xf32> to vector<8x1xf32>
    %74 = vector.broadcast %73 : vector<8x1xf32> to vector<8x8xf32>
    %75 = arith.subf %71, %74 : vector<8x8xf32>
    %76 = math.exp %75 : vector<8x8xf32>
    %cst_23 = arith.constant dense<0.000000e+00> : vector<8xf32>
    %77 = vector.multi_reduction <add>, %76, %cst_23 [1] : vector<8x8xf32> to vector<8xf32>
    %78 = vector.shape_cast %77 : vector<8xf32> to vector<8x1xf32>
    %79 = tpu.reciprocal %78 {approx = true} : vector<8x1xf32> -> vector<8x1xf32>
    %80 = vector.broadcast %79 : vector<8x1xf32> to vector<8x8xf32>
    %81 = arith.mulf %76, %80 : vector<8x8xf32>
    %82 = arith.truncf %81 : vector<8x8xf32> to vector<8x8xbf16>
    %cst_24 = arith.constant dense<0.000000e+00> : vector<8x8xf32>
    %83 = tpu.matmul %82, %70, %cst_24 {dimension_numbers = #tpu.dot_dimension_numbers<[1], [0], [0], [1], [0, 0, 1, 1], [], []>} : vector<8x8xbf16>, vector<8x8xbf16>, vector<8x8xf32> -> vector<8x8xf32>
    %84 = vector.extract_strided_slice %26 {offsets = [0, 24], sizes = [8, 8], strides = [1, 1]} : vector<8x96xf32> to vector<8x8xf32>
    %85 = arith.truncf %84 : vector<8x8xf32> to vector<8x8xbf16>
    %86 = vector.extract_strided_slice %26 {offsets = [0, 56], sizes = [8, 8], strides = [1, 1]} : vector<8x96xf32> to vector<8x8xf32>
    %87 = arith.truncf %86 : vector<8x8xf32> to vector<8x8xbf16>
    %88 = vector.extract_strided_slice %26 {offsets = [0, 88], sizes = [8, 8], strides = [1, 1]} : vector<8x96xf32> to vector<8x8xf32>
    %89 = arith.truncf %88 : vector<8x8xf32> to vector<8x8xbf16>
    %cst_25 = arith.constant dense<0.000000e+00> : vector<8x8xf32>
    %90 = tpu.matmul %85, %87, %cst_25 {dimension_numbers = #tpu.dot_dimension_numbers<[1], [1], [0], [0], [0, 0, 1, 0], [], []>} : vector<8x8xbf16>, vector<8x8xbf16>, vector<8x8xf32> -> vector<8x8xf32>
    %cst_26 = arith.constant dense<0xFF800000> : vector<8xf32>
    %91 = vector.multi_reduction <maximumf>, %90, %cst_26 [1] : vector<8x8xf32> to vector<8xf32>
    %92 = vector.shape_cast %91 : vector<8xf32> to vector<8x1xf32>
    %93 = vector.broadcast %92 : vector<8x1xf32> to vector<8x8xf32>
    %94 = arith.subf %90, %93 : vector<8x8xf32>
    %95 = math.exp %94 : vector<8x8xf32>
    %cst_27 = arith.constant dense<0.000000e+00> : vector<8xf32>
    %96 = vector.multi_reduction <add>, %95, %cst_27 [1] : vector<8x8xf32> to vector<8xf32>
    %97 = vector.shape_cast %96 : vector<8xf32> to vector<8x1xf32>
    %98 = tpu.reciprocal %97 {approx = true} : vector<8x1xf32> -> vector<8x1xf32>
    %99 = vector.broadcast %98 : vector<8x1xf32> to vector<8x8xf32>
    %100 = arith.mulf %95, %99 : vector<8x8xf32>
    %101 = arith.truncf %100 : vector<8x8xf32> to vector<8x8xbf16>
    %cst_28 = arith.constant dense<0.000000e+00> : vector<8x8xf32>
    %102 = tpu.matmul %101, %89, %cst_28 {dimension_numbers = #tpu.dot_dimension_numbers<[1], [0], [0], [1], [0, 0, 1, 1], [], []>} : vector<8x8xbf16>, vector<8x8xbf16>, vector<8x8xf32> -> vector<8x8xf32>
    %103 = tpu.concatenate %45, %64, %83, %102 in 1 : vector<8x8xf32>, vector<8x8xf32>, vector<8x8xf32>, vector<8x8xf32> -> vector<8x32xf32>
    %104 = arith.truncf %103 : vector<8x32xf32> to vector<8x32xbf16>
    %cst_29 = arith.constant dense<0.000000e+00> : vector<8x32xf32>
    %105 = tpu.matmul %104, %7, %cst_29 {dimension_numbers = #tpu.dot_dimension_numbers<[1], [0], [0], [1], [0, 0, 1, 1], [], []>} : vector<8x32xbf16>, vector<32x32xbf16>, vector<8x32xf32> -> vector<8x32xf32>
    %106 = vector.broadcast %20 : vector<1x32xf32> to vector<8x32xf32>
    %107 = arith.addf %105, %106 : vector<8x32xf32>
    %108 = arith.addf %107, %0 : vector<8x32xf32>
    %cst_30 = arith.constant dense<0.000000e+00> : vector<8xf32>
    %109 = vector.multi_reduction <add>, %108, %cst_30 [1] : vector<8x32xf32> to vector<8xf32>
    %110 = vector.shape_cast %109 : vector<8xf32> to vector<8x1xf32>
    %cst_31 = arith.constant 3.200000e+01 : f32
    %111 = vector.broadcast %cst_31 : f32 to vector<8x1xf32>
    %112 = arith.divf %110, %111 : vector<8x1xf32>
    %113 = vector.broadcast %112 : vector<8x1xf32> to vector<8x32xf32>
    %114 = arith.subf %108, %113 : vector<8x32xf32>
    %115 = arith.mulf %114, %114 : vector<8x32xf32>
    %cst_32 = arith.constant dense<0.000000e+00> : vector<8xf32>
    %116 = vector.multi_reduction <add>, %115, %cst_32 [1] : vector<8x32xf32> to vector<8xf32>
    %117 = vector.shape_cast %116 : vector<8xf32> to vector<8x1xf32>
    %cst_33 = arith.constant 3.200000e+01 : f32
    %118 = vector.broadcast %cst_33 : f32 to vector<8x1xf32>
    %119 = arith.divf %117, %118 : vector<8x1xf32>
    %120 = vector.broadcast %112 : vector<8x1xf32> to vector<8x32xf32>
    %121 = arith.subf %108, %120 : vector<8x32xf32>
    %cst_34 = arith.constant 9.99999974E-6 : f32
    %122 = vector.broadcast %cst_34 : f32 to vector<8x1xf32>
    %123 = arith.addf %119, %122 : vector<8x1xf32>
    %124 = math.rsqrt %123 : vector<8x1xf32>
    %125 = vector.broadcast %124 : vector<8x1xf32> to vector<8x32xf32>
    %126 = arith.mulf %121, %125 : vector<8x32xf32>
    %127 = vector.broadcast %21 : vector<1x32xf32> to vector<8x32xf32>
    %128 = arith.mulf %126, %127 : vector<8x32xf32>
    %129 = vector.broadcast %22 : vector<1x32xf32> to vector<8x32xf32>
    %130 = arith.addf %128, %129 : vector<8x32xf32>
    %131 = arith.truncf %130 : vector<8x32xf32> to vector<8x32xbf16>
    %cst_35 = arith.constant dense<0.000000e+00> : vector<8x64xf32>
    %132 = tpu.matmul %131, %10, %cst_35 {dimension_numbers = #tpu.dot_dimension_numbers<[1], [0], [0], [1], [0, 0, 1, 1], [], []>} : vector<8x32xbf16>, vector<32x64xbf16>, vector<8x64xf32> -> vector<8x64xf32>
    %133 = vector.broadcast %19 : vector<1x64xf32> to vector<8x64xf32>
    %134 = arith.addf %132, %133 : vector<8x64xf32>
    %cst_36 = arith.constant 0.000000e+00 : f32
    %135 = vector.broadcast %cst_36 : f32 to vector<8x64xf32>
    %136 = arith.maximumf %134, %135 : vector<8x64xf32>
    %137 = arith.truncf %136 : vector<8x64xf32> to vector<8x64xbf16>
    %cst_37 = arith.constant dense<0.000000e+00> : vector<8x32xf32>
    %138 = tpu.matmul %137, %13, %cst_37 {dimension_numbers = #tpu.dot_dimension_numbers<[1], [0], [0], [1], [0, 0, 1, 1], [], []>} : vector<8x64xbf16>, vector<64x32xbf16>, vector<8x32xf32> -> vector<8x32xf32>
    %139 = vector.broadcast %23 : vector<1x32xf32> to vector<8x32xf32>
    %140 = arith.addf %138, %139 : vector<8x32xf32>
    %141 = arith.addf %140, %130 : vector<8x32xf32>
    %cst_38 = arith.constant dense<0.000000e+00> : vector<8xf32>
    %142 = vector.multi_reduction <add>, %141, %cst_38 [1] : vector<8x32xf32> to vector<8xf32>
    %143 = vector.shape_cast %142 : vector<8xf32> to vector<8x1xf32>
    %cst_39 = arith.constant 3.200000e+01 : f32
    %144 = vector.broadcast %cst_39 : f32 to vector<8x1xf32>
    %145 = arith.divf %143, %144 : vector<8x1xf32>
    %146 = vector.broadcast %145 : vector<8x1xf32> to vector<8x32xf32>
    %147 = arith.subf %141, %146 : vector<8x32xf32>
    %148 = arith.mulf %147, %147 : vector<8x32xf32>
    %cst_40 = arith.constant dense<0.000000e+00> : vector<8xf32>
    %149 = vector.multi_reduction <add>, %148, %cst_40 [1] : vector<8x32xf32> to vector<8xf32>
    %150 = vector.shape_cast %149 : vector<8xf32> to vector<8x1xf32>
    %cst_41 = arith.constant 3.200000e+01 : f32
    %151 = vector.broadcast %cst_41 : f32 to vector<8x1xf32>
    %152 = arith.divf %150, %151 : vector<8x1xf32>
    %153 = vector.broadcast %145 : vector<8x1xf32> to vector<8x32xf32>
    %154 = arith.subf %141, %153 : vector<8x32xf32>
    %cst_42 = arith.constant 9.99999974E-6 : f32
    %155 = vector.broadcast %cst_42 : f32 to vector<8x1xf32>
    %156 = arith.addf %152, %155 : vector<8x1xf32>
    %157 = math.rsqrt %156 : vector<8x1xf32>
    %158 = vector.broadcast %157 : vector<8x1xf32> to vector<8x32xf32>
    %159 = arith.mulf %154, %158 : vector<8x32xf32>
    %160 = vector.broadcast %24 : vector<1x32xf32> to vector<8x32xf32>
    %161 = arith.mulf %159, %160 : vector<8x32xf32>
    %162 = vector.broadcast %25 : vector<1x32xf32> to vector<8x32xf32>
    %163 = arith.addf %161, %162 : vector<8x32xf32>
    %c1_i32 = arith.constant 1 : i32
    %164 = arith.truncf %163 : vector<8x32xf32> to vector<8x32xbf16>
    %165 = arith.index_cast %c1_i32 : i32 to index
    %c0_43 = arith.constant 0 : index
    %c0_44 = arith.constant 0 : index
    %166 = vector.load %arg1[%165, %c0_43, %c0_44] : memref<2x32x96xbf16, #tpu.memory_space<vmem>>, vector<1x32x96xbf16>
    %167 = vector.shape_cast %166 : vector<1x32x96xbf16> to vector<32x96xbf16>
    %168 = arith.index_cast %c1_i32 : i32 to index
    %c0_45 = arith.constant 0 : index
    %c0_46 = arith.constant 0 : index
    %169 = vector.load %arg2[%168, %c0_45, %c0_46] : memref<2x32x32xbf16, #tpu.memory_space<vmem>>, vector<1x32x32xbf16>
    %170 = vector.shape_cast %169 : vector<1x32x32xbf16> to vector<32x32xbf16>
    %171 = arith.index_cast %c1_i32 : i32 to index
    %c0_47 = arith.constant 0 : index
    %c0_48 = arith.constant 0 : index
    %172 = vector.load %arg3[%171, %c0_47, %c0_48] : memref<2x32x64xbf16, #tpu.memory_space<vmem>>, vector<1x32x64xbf16>
    %173 = vector.shape_cast %172 : vector<1x32x64xbf16> to vector<32x64xbf16>
    %174 = arith.index_cast %c1_i32 : i32 to index
    %c0_49 = arith.constant 0 : index
    %c0_50 = arith.constant 0 : index
    %175 = vector.load %arg4[%174, %c0_49, %c0_50] : memref<2x64x32xbf16, #tpu.memory_space<vmem>>, vector<1x64x32xbf16>
    %176 = vector.shape_cast %175 : vector<1x64x32xbf16> to vector<64x32xbf16>
    %177 = arith.index_cast %c1_i32 : i32 to index
    %c0_51 = arith.constant 0 : index
    %c0_52 = arith.constant 0 : index
    %178 = vector.load %arg5[%177, %c0_51, %c0_52] : memref<2x6x32xf32, #tpu.memory_space<vmem>>, vector<1x6x32xf32>
    %179 = vector.shape_cast %178 : vector<1x6x32xf32> to vector<6x32xf32>
    %180 = arith.index_cast %c1_i32 : i32 to index
    %c0_53 = arith.constant 0 : index
    %c0_54 = arith.constant 0 : index
    %181 = vector.load %arg6[%180, %c0_53, %c0_54] : memref<2x1x64xf32, #tpu.memory_space<vmem>>, vector<1x1x64xf32>
    %182 = vector.shape_cast %181 : vector<1x1x64xf32> to vector<1x64xf32>
    %183 = vector.extract_strided_slice %179 {offsets = [0, 0], sizes = [1, 32], strides = [1, 1]} : vector<6x32xf32> to vector<1x32xf32>
    %184 = vector.extract_strided_slice %179 {offsets = [1, 0], sizes = [1, 32], strides = [1, 1]} : vector<6x32xf32> to vector<1x32xf32>
    %185 = vector.extract_strided_slice %179 {offsets = [2, 0], sizes = [1, 32], strides = [1, 1]} : vector<6x32xf32> to vector<1x32xf32>
    %186 = vector.extract_strided_slice %179 {offsets = [3, 0], sizes = [1, 32], strides = [1, 1]} : vector<6x32xf32> to vector<1x32xf32>
    %187 = vector.extract_strided_slice %179 {offsets = [4, 0], sizes = [1, 32], strides = [1, 1]} : vector<6x32xf32> to vector<1x32xf32>
    %188 = vector.extract_strided_slice %179 {offsets = [5, 0], sizes = [1, 32], strides = [1, 1]} : vector<6x32xf32> to vector<1x32xf32>
    %cst_55 = arith.constant dense<0.000000e+00> : vector<8x96xf32>
    %189 = tpu.matmul %164, %167, %cst_55 {dimension_numbers = #tpu.dot_dimension_numbers<[1], [0], [0], [1], [0, 0, 1, 1], [], []>} : vector<8x32xbf16>, vector<32x96xbf16>, vector<8x96xf32> -> vector<8x96xf32>
    %190 = vector.extract_strided_slice %189 {offsets = [0, 0], sizes = [8, 8], strides = [1, 1]} : vector<8x96xf32> to vector<8x8xf32>
    %191 = arith.truncf %190 : vector<8x8xf32> to vector<8x8xbf16>
    %192 = vector.extract_strided_slice %189 {offsets = [0, 32], sizes = [8, 8], strides = [1, 1]} : vector<8x96xf32> to vector<8x8xf32>
    %193 = arith.truncf %192 : vector<8x8xf32> to vector<8x8xbf16>
    %194 = vector.extract_strided_slice %189 {offsets = [0, 64], sizes = [8, 8], strides = [1, 1]} : vector<8x96xf32> to vector<8x8xf32>
    %195 = arith.truncf %194 : vector<8x8xf32> to vector<8x8xbf16>
    %cst_56 = arith.constant dense<0.000000e+00> : vector<8x8xf32>
    %196 = tpu.matmul %191, %193, %cst_56 {dimension_numbers = #tpu.dot_dimension_numbers<[1], [1], [0], [0], [0, 0, 1, 0], [], []>} : vector<8x8xbf16>, vector<8x8xbf16>, vector<8x8xf32> -> vector<8x8xf32>
    %cst_57 = arith.constant dense<0xFF800000> : vector<8xf32>
    %197 = vector.multi_reduction <maximumf>, %196, %cst_57 [1] : vector<8x8xf32> to vector<8xf32>
    %198 = vector.shape_cast %197 : vector<8xf32> to vector<8x1xf32>
    %199 = vector.broadcast %198 : vector<8x1xf32> to vector<8x8xf32>
    %200 = arith.subf %196, %199 : vector<8x8xf32>
    %201 = math.exp %200 : vector<8x8xf32>
    %cst_58 = arith.constant dense<0.000000e+00> : vector<8xf32>
    %202 = vector.multi_reduction <add>, %201, %cst_58 [1] : vector<8x8xf32> to vector<8xf32>
    %203 = vector.shape_cast %202 : vector<8xf32> to vector<8x1xf32>
    %204 = tpu.reciprocal %203 {approx = true} : vector<8x1xf32> -> vector<8x1xf32>
    %205 = vector.broadcast %204 : vector<8x1xf32> to vector<8x8xf32>
    %206 = arith.mulf %201, %205 : vector<8x8xf32>
    %207 = arith.truncf %206 : vector<8x8xf32> to vector<8x8xbf16>
    %cst_59 = arith.constant dense<0.000000e+00> : vector<8x8xf32>
    %208 = tpu.matmul %207, %195, %cst_59 {dimension_numbers = #tpu.dot_dimension_numbers<[1], [0], [0], [1], [0, 0, 1, 1], [], []>} : vector<8x8xbf16>, vector<8x8xbf16>, vector<8x8xf32> -> vector<8x8xf32>
    %209 = vector.extract_strided_slice %189 {offsets = [0, 8], sizes = [8, 8], strides = [1, 1]} : vector<8x96xf32> to vector<8x8xf32>
    %210 = arith.truncf %209 : vector<8x8xf32> to vector<8x8xbf16>
    %211 = vector.extract_strided_slice %189 {offsets = [0, 40], sizes = [8, 8], strides = [1, 1]} : vector<8x96xf32> to vector<8x8xf32>
    %212 = arith.truncf %211 : vector<8x8xf32> to vector<8x8xbf16>
    %213 = vector.extract_strided_slice %189 {offsets = [0, 72], sizes = [8, 8], strides = [1, 1]} : vector<8x96xf32> to vector<8x8xf32>
    %214 = arith.truncf %213 : vector<8x8xf32> to vector<8x8xbf16>
    %cst_60 = arith.constant dense<0.000000e+00> : vector<8x8xf32>
    %215 = tpu.matmul %210, %212, %cst_60 {dimension_numbers = #tpu.dot_dimension_numbers<[1], [1], [0], [0], [0, 0, 1, 0], [], []>} : vector<8x8xbf16>, vector<8x8xbf16>, vector<8x8xf32> -> vector<8x8xf32>
    %cst_61 = arith.constant dense<0xFF800000> : vector<8xf32>
    %216 = vector.multi_reduction <maximumf>, %215, %cst_61 [1] : vector<8x8xf32> to vector<8xf32>
    %217 = vector.shape_cast %216 : vector<8xf32> to vector<8x1xf32>
    %218 = vector.broadcast %217 : vector<8x1xf32> to vector<8x8xf32>
    %219 = arith.subf %215, %218 : vector<8x8xf32>
    %220 = math.exp %219 : vector<8x8xf32>
    %cst_62 = arith.constant dense<0.000000e+00> : vector<8xf32>
    %221 = vector.multi_reduction <add>, %220, %cst_62 [1] : vector<8x8xf32> to vector<8xf32>
    %222 = vector.shape_cast %221 : vector<8xf32> to vector<8x1xf32>
    %223 = tpu.reciprocal %222 {approx = true} : vector<8x1xf32> -> vector<8x1xf32>
    %224 = vector.broadcast %223 : vector<8x1xf32> to vector<8x8xf32>
    %225 = arith.mulf %220, %224 : vector<8x8xf32>
    %226 = arith.truncf %225 : vector<8x8xf32> to vector<8x8xbf16>
    %cst_63 = arith.constant dense<0.000000e+00> : vector<8x8xf32>
    %227 = tpu.matmul %226, %214, %cst_63 {dimension_numbers = #tpu.dot_dimension_numbers<[1], [0], [0], [1], [0, 0, 1, 1], [], []>} : vector<8x8xbf16>, vector<8x8xbf16>, vector<8x8xf32> -> vector<8x8xf32>
    %228 = vector.extract_strided_slice %189 {offsets = [0, 16], sizes = [8, 8], strides = [1, 1]} : vector<8x96xf32> to vector<8x8xf32>
    %229 = arith.truncf %228 : vector<8x8xf32> to vector<8x8xbf16>
    %230 = vector.extract_strided_slice %189 {offsets = [0, 48], sizes = [8, 8], strides = [1, 1]} : vector<8x96xf32> to vector<8x8xf32>
    %231 = arith.truncf %230 : vector<8x8xf32> to vector<8x8xbf16>
    %232 = vector.extract_strided_slice %189 {offsets = [0, 80], sizes = [8, 8], strides = [1, 1]} : vector<8x96xf32> to vector<8x8xf32>
    %233 = arith.truncf %232 : vector<8x8xf32> to vector<8x8xbf16>
    %cst_64 = arith.constant dense<0.000000e+00> : vector<8x8xf32>
    %234 = tpu.matmul %229, %231, %cst_64 {dimension_numbers = #tpu.dot_dimension_numbers<[1], [1], [0], [0], [0, 0, 1, 0], [], []>} : vector<8x8xbf16>, vector<8x8xbf16>, vector<8x8xf32> -> vector<8x8xf32>
    %cst_65 = arith.constant dense<0xFF800000> : vector<8xf32>
    %235 = vector.multi_reduction <maximumf>, %234, %cst_65 [1] : vector<8x8xf32> to vector<8xf32>
    %236 = vector.shape_cast %235 : vector<8xf32> to vector<8x1xf32>
    %237 = vector.broadcast %236 : vector<8x1xf32> to vector<8x8xf32>
    %238 = arith.subf %234, %237 : vector<8x8xf32>
    %239 = math.exp %238 : vector<8x8xf32>
    %cst_66 = arith.constant dense<0.000000e+00> : vector<8xf32>
    %240 = vector.multi_reduction <add>, %239, %cst_66 [1] : vector<8x8xf32> to vector<8xf32>
    %241 = vector.shape_cast %240 : vector<8xf32> to vector<8x1xf32>
    %242 = tpu.reciprocal %241 {approx = true} : vector<8x1xf32> -> vector<8x1xf32>
    %243 = vector.broadcast %242 : vector<8x1xf32> to vector<8x8xf32>
    %244 = arith.mulf %239, %243 : vector<8x8xf32>
    %245 = arith.truncf %244 : vector<8x8xf32> to vector<8x8xbf16>
    %cst_67 = arith.constant dense<0.000000e+00> : vector<8x8xf32>
    %246 = tpu.matmul %245, %233, %cst_67 {dimension_numbers = #tpu.dot_dimension_numbers<[1], [0], [0], [1], [0, 0, 1, 1], [], []>} : vector<8x8xbf16>, vector<8x8xbf16>, vector<8x8xf32> -> vector<8x8xf32>
    %247 = vector.extract_strided_slice %189 {offsets = [0, 24], sizes = [8, 8], strides = [1, 1]} : vector<8x96xf32> to vector<8x8xf32>
    %248 = arith.truncf %247 : vector<8x8xf32> to vector<8x8xbf16>
    %249 = vector.extract_strided_slice %189 {offsets = [0, 56], sizes = [8, 8], strides = [1, 1]} : vector<8x96xf32> to vector<8x8xf32>
    %250 = arith.truncf %249 : vector<8x8xf32> to vector<8x8xbf16>
    %251 = vector.extract_strided_slice %189 {offsets = [0, 88], sizes = [8, 8], strides = [1, 1]} : vector<8x96xf32> to vector<8x8xf32>
    %252 = arith.truncf %251 : vector<8x8xf32> to vector<8x8xbf16>
    %cst_68 = arith.constant dense<0.000000e+00> : vector<8x8xf32>
    %253 = tpu.matmul %248, %250, %cst_68 {dimension_numbers = #tpu.dot_dimension_numbers<[1], [1], [0], [0], [0, 0, 1, 0], [], []>} : vector<8x8xbf16>, vector<8x8xbf16>, vector<8x8xf32> -> vector<8x8xf32>
    %cst_69 = arith.constant dense<0xFF800000> : vector<8xf32>
    %254 = vector.multi_reduction <maximumf>, %253, %cst_69 [1] : vector<8x8xf32> to vector<8xf32>
    %255 = vector.shape_cast %254 : vector<8xf32> to vector<8x1xf32>
    %256 = vector.broadcast %255 : vector<8x1xf32> to vector<8x8xf32>
    %257 = arith.subf %253, %256 : vector<8x8xf32>
    %258 = math.exp %257 : vector<8x8xf32>
    %cst_70 = arith.constant dense<0.000000e+00> : vector<8xf32>
    %259 = vector.multi_reduction <add>, %258, %cst_70 [1] : vector<8x8xf32> to vector<8xf32>
    %260 = vector.shape_cast %259 : vector<8xf32> to vector<8x1xf32>
    %261 = tpu.reciprocal %260 {approx = true} : vector<8x1xf32> -> vector<8x1xf32>
    %262 = vector.broadcast %261 : vector<8x1xf32> to vector<8x8xf32>
    %263 = arith.mulf %258, %262 : vector<8x8xf32>
    %264 = arith.truncf %263 : vector<8x8xf32> to vector<8x8xbf16>
    %cst_71 = arith.constant dense<0.000000e+00> : vector<8x8xf32>
    %265 = tpu.matmul %264, %252, %cst_71 {dimension_numbers = #tpu.dot_dimension_numbers<[1], [0], [0], [1], [0, 0, 1, 1], [], []>} : vector<8x8xbf16>, vector<8x8xbf16>, vector<8x8xf32> -> vector<8x8xf32>
    %266 = tpu.concatenate %208, %227, %246, %265 in 1 : vector<8x8xf32>, vector<8x8xf32>, vector<8x8xf32>, vector<8x8xf32> -> vector<8x32xf32>
    %267 = arith.truncf %266 : vector<8x32xf32> to vector<8x32xbf16>
    %cst_72 = arith.constant dense<0.000000e+00> : vector<8x32xf32>
    %268 = tpu.matmul %267, %170, %cst_72 {dimension_numbers = #tpu.dot_dimension_numbers<[1], [0], [0], [1], [0, 0, 1, 1], [], []>} : vector<8x32xbf16>, vector<32x32xbf16>, vector<8x32xf32> -> vector<8x32xf32>
    %269 = vector.broadcast %183 : vector<1x32xf32> to vector<8x32xf32>
    %270 = arith.addf %268, %269 : vector<8x32xf32>
    %271 = arith.addf %270, %163 : vector<8x32xf32>
    %cst_73 = arith.constant dense<0.000000e+00> : vector<8xf32>
    %272 = vector.multi_reduction <add>, %271, %cst_73 [1] : vector<8x32xf32> to vector<8xf32>
    %273 = vector.shape_cast %272 : vector<8xf32> to vector<8x1xf32>
    %cst_74 = arith.constant 3.200000e+01 : f32
    %274 = vector.broadcast %cst_74 : f32 to vector<8x1xf32>
    %275 = arith.divf %273, %274 : vector<8x1xf32>
    %276 = vector.broadcast %275 : vector<8x1xf32> to vector<8x32xf32>
    %277 = arith.subf %271, %276 : vector<8x32xf32>
    %278 = arith.mulf %277, %277 : vector<8x32xf32>
    %cst_75 = arith.constant dense<0.000000e+00> : vector<8xf32>
    %279 = vector.multi_reduction <add>, %278, %cst_75 [1] : vector<8x32xf32> to vector<8xf32>
    %280 = vector.shape_cast %279 : vector<8xf32> to vector<8x1xf32>
    %cst_76 = arith.constant 3.200000e+01 : f32
    %281 = vector.broadcast %cst_76 : f32 to vector<8x1xf32>
    %282 = arith.divf %280, %281 : vector<8x1xf32>
    %283 = vector.broadcast %275 : vector<8x1xf32> to vector<8x32xf32>
    %284 = arith.subf %271, %283 : vector<8x32xf32>
    %cst_77 = arith.constant 9.99999974E-6 : f32
    %285 = vector.broadcast %cst_77 : f32 to vector<8x1xf32>
    %286 = arith.addf %282, %285 : vector<8x1xf32>
    %287 = math.rsqrt %286 : vector<8x1xf32>
    %288 = vector.broadcast %287 : vector<8x1xf32> to vector<8x32xf32>
    %289 = arith.mulf %284, %288 : vector<8x32xf32>
    %290 = vector.broadcast %184 : vector<1x32xf32> to vector<8x32xf32>
    %291 = arith.mulf %289, %290 : vector<8x32xf32>
    %292 = vector.broadcast %185 : vector<1x32xf32> to vector<8x32xf32>
    %293 = arith.addf %291, %292 : vector<8x32xf32>
    %294 = arith.truncf %293 : vector<8x32xf32> to vector<8x32xbf16>
    %cst_78 = arith.constant dense<0.000000e+00> : vector<8x64xf32>
    %295 = tpu.matmul %294, %173, %cst_78 {dimension_numbers = #tpu.dot_dimension_numbers<[1], [0], [0], [1], [0, 0, 1, 1], [], []>} : vector<8x32xbf16>, vector<32x64xbf16>, vector<8x64xf32> -> vector<8x64xf32>
    %296 = vector.broadcast %182 : vector<1x64xf32> to vector<8x64xf32>
    %297 = arith.addf %295, %296 : vector<8x64xf32>
    %cst_79 = arith.constant 0.000000e+00 : f32
    %298 = vector.broadcast %cst_79 : f32 to vector<8x64xf32>
    %299 = arith.maximumf %297, %298 : vector<8x64xf32>
    %300 = arith.truncf %299 : vector<8x64xf32> to vector<8x64xbf16>
    %cst_80 = arith.constant dense<0.000000e+00> : vector<8x32xf32>
    %301 = tpu.matmul %300, %176, %cst_80 {dimension_numbers = #tpu.dot_dimension_numbers<[1], [0], [0], [1], [0, 0, 1, 1], [], []>} : vector<8x64xbf16>, vector<64x32xbf16>, vector<8x32xf32> -> vector<8x32xf32>
    %302 = vector.broadcast %186 : vector<1x32xf32> to vector<8x32xf32>
    %303 = arith.addf %301, %302 : vector<8x32xf32>
    %304 = arith.addf %303, %293 : vector<8x32xf32>
    %cst_81 = arith.constant dense<0.000000e+00> : vector<8xf32>
    %305 = vector.multi_reduction <add>, %304, %cst_81 [1] : vector<8x32xf32> to vector<8xf32>
    %306 = vector.shape_cast %305 : vector<8xf32> to vector<8x1xf32>
    %cst_82 = arith.constant 3.200000e+01 : f32
    %307 = vector.broadcast %cst_82 : f32 to vector<8x1xf32>
    %308 = arith.divf %306, %307 : vector<8x1xf32>
    %309 = vector.broadcast %308 : vector<8x1xf32> to vector<8x32xf32>
    %310 = arith.subf %304, %309 : vector<8x32xf32>
    %311 = arith.mulf %310, %310 : vector<8x32xf32>
    %cst_83 = arith.constant dense<0.000000e+00> : vector<8xf32>
    %312 = vector.multi_reduction <add>, %311, %cst_83 [1] : vector<8x32xf32> to vector<8xf32>
    %313 = vector.shape_cast %312 : vector<8xf32> to vector<8x1xf32>
    %cst_84 = arith.constant 3.200000e+01 : f32
    %314 = vector.broadcast %cst_84 : f32 to vector<8x1xf32>
    %315 = arith.divf %313, %314 : vector<8x1xf32>
    %316 = vector.broadcast %308 : vector<8x1xf32> to vector<8x32xf32>
    %317 = arith.subf %304, %316 : vector<8x32xf32>
    %cst_85 = arith.constant 9.99999974E-6 : f32
    %318 = vector.broadcast %cst_85 : f32 to vector<8x1xf32>
    %319 = arith.addf %315, %318 : vector<8x1xf32>
    %320 = math.rsqrt %319 : vector<8x1xf32>
    %321 = vector.broadcast %320 : vector<8x1xf32> to vector<8x32xf32>
    %322 = arith.mulf %317, %321 : vector<8x32xf32>
    %323 = vector.broadcast %187 : vector<1x32xf32> to vector<8x32xf32>
    %324 = arith.mulf %322, %323 : vector<8x32xf32>
    %325 = vector.broadcast %188 : vector<1x32xf32> to vector<8x32xf32>
    %326 = arith.addf %324, %325 : vector<8x32xf32>
    %c2_i32 = arith.constant 2 : i32
    %c0_86 = arith.constant 0 : index
    %c0_87 = arith.constant 0 : index
    %327 = vector.load %arg7[%c0_86, %c0_87] : memref<8x32xf32, #tpu.memory_space<vmem>>, vector<8x32xf32>
    tpu.vector_store %arg7[%c0_86, %c0_87], %326 {strides = array<i32>} : memref<8x32xf32, #tpu.memory_space<vmem>>, vector<8x32xf32>,
    return
  }
}

</mosaic_0001>

<bundles_post_ra>
// kernel: tpu_custom_call.1
= control target key start
LH: loop header
LB: loop body
LE: loop exit
PB: predicated region body
PF: predicated region fallthrough
CT: control target
= control target key end

     0   :  { %12 = vsyncpa [#allocation3], 0  ;;  %s2700_s0 = inlined_call_operand.hbm [shape: f32[8,32], index: 0, kind: input, shape index: {}]   ;;  %s2701_s1 = inlined_call_operand.hbm [shape: bf16[2,32,96], index: 1, kind: input, shape index: {}]   ;;  %s2702_s2 = inlined_call_operand.hbm [shape: bf16[2,32,32], index: 2, kind: input, shape index: {}]   ;;  %s2703_s3 = inlined_call_operand.hbm [shape: bf16[2,32,64], index: 3, kind: input, shape index: {}]   ;;  %s2704_s4 = inlined_call_operand.hbm [shape: bf16[2,64,32], index: 4, kind: input, shape index: {}]   ;;  %s2705_s5 = inlined_call_operand.hbm [shape: f32[2,6,32], index: 5, kind: input, shape index: {}]   ;;  %s2706_s6 = inlined_call_operand.hbm [shape: f32[2,1,64], index: 6, kind: input, shape index: {}]   ;;  %s2707_s7 = inlined_call_operand.hbm [shape: f32[8,32], index: 7, kind: output, shape index: {}]  }
   0x1   :  { %13 = vsyncpa [#allocation6], 0 }
   0x2   :  { %14 = vsyncpa [#allocation9], 0 }
   0x3   :  { %15 = vsyncpa [#allocation12], 0 }
   0x4   :  { %16 = vsyncpa [#allocation4], 0  ;;  %s2253_s24 = smov [#allocation5]   ;;  %s2067_s28 = scalar_lea.hbm %s2701_s1, 512 }
   0x5   :  { %s32_s25 = sshll.u32 %s2253_s24, 4  ;;  %p2068_p0 = scmp.ne.s32.totalorder %s2701_s1, %s2067_s28  ;;  %s33_s25 = int_to_ptr.vmem [resolvable:$true] %s32_s25 }
   0x6   :  { %p2071_p1 = scmp.lt.u32.totalorder %s2067_s28, %s2701_s1 }
   0x8   :  { %p2073_p2 = pnand %p2071_p1, %p2068_p0 }
   0xa   :  { %2076 = shalt.err (!%p2073_p2)
}
   0xb   :  { %s2077_s10 = scalar_lea.vmem %s33_s25, 512  ;;  %p2082_p4 = scmp.lt.s32.totalorder %s33_s25, %s33_s25 }
   0xc   :  { %p2078_p3 = scmp.ne.s32.totalorder %s33_s25, %s2077_s10  ;;  %p2083_p5 = scmp.lt.s32.totalorder %s2077_s10, %s2077_s10 }
   0xe   :  { %p2084_p6 = por %p2083_p5, %p2082_p4 }
  0x10   :  { %p2085_p7 = pnand %p2084_p6, %p2078_p3 }
  0x12   :  { %2088 = shalt.err (!%p2085_p7)
}
  0x13   :  { %s2254_s11 = smov 64   ;;  %s2255_s12 = smov 4  }
  0x14   :  { %38 = dma.hbm_to_vmem [thread:$0]  %s2701_s1, 512, %s33_s25, [#allocation6], %s2254_s11, %s2254_s11, %s2255_s12  }
  0x15   :  { %s2256_s15 = smov [#allocation8]   ;;  %s2257_s17 = smov [#allocation11]  }
  0x16   :  { %s56_s16 = sshll.u32 %s2256_s15, 4  ;;  %s80_s18 = sshll.u32 %s2257_s17, 4  ;;  %s57_s16 = int_to_ptr.vmem [resolvable:$true] %s56_s16  ;;  %s81_s18 = int_to_ptr.vmem [resolvable:$true] %s80_s18 }
  0x17   :  { %s2089_s21 = scalar_lea.hbm %s2703_s3, 512 }
  0x18   :  { %p2090_p8 = scmp.ne.s32.totalorder %s2703_s3, %s2089_s21  ;;  %p2093_p9 = scmp.lt.u32.totalorder %s2089_s21, %s2703_s3 }
  0x1a   :  { %p2095_p10 = pnand %p2093_p9, %p2090_p8 }
  0x1c   :  { %2098 = shalt.err (!%p2095_p10)
}
  0x1d   :  { %s2099_s1 = scalar_lea.vmem %s57_s16, 512  ;;  %p2104_p12 = scmp.lt.s32.totalorder %s57_s16, %s57_s16 }
  0x1e   :  { %p2100_p11 = scmp.ne.s32.totalorder %s57_s16, %s2099_s1  ;;  %p2105_p13 = scmp.lt.s32.totalorder %s2099_s1, %s2099_s1 }
  0x20   :  { %p2106_p0 = por %p2105_p13, %p2104_p12 }
  0x22   :  { %p2107_p1 = pnand %p2106_p0, %p2100_p11 }
  0x24   :  { %2110 = shalt.err (!%p2107_p1)
}
  0x25   :  { %62 = dma.hbm_to_vmem [thread:$0]  %s2703_s3, 512, %s57_s16, [#allocation9], %s2254_s11, %s2254_s11, %s2255_s12  }
  0x26   :  { %s2111_s30 = scalar_lea.hbm %s2705_s5, 256 }
  0x27   :  { %p2112_p2 = scmp.ne.s32.totalorder %s2705_s5, %s2111_s30  ;;  %p2115_p3 = scmp.lt.u32.totalorder %s2111_s30, %s2705_s5 }
  0x29   :  { %p2117_p4 = pnand %p2115_p3, %p2112_p2 }
  0x2b   :  { %2120 = shalt.err (!%p2117_p4)
}
  0x2c   :  { %s2121_s14 = scalar_lea.vmem %s81_s18, 256  ;;  %p2126_p6 = scmp.lt.s32.totalorder %s81_s18, %s81_s18 }
  0x2d   :  { %p2122_p5 = scmp.ne.s32.totalorder %s81_s18, %s2121_s14  ;;  %p2127_p7 = scmp.lt.s32.totalorder %s2121_s14, %s2121_s14 }
  0x2f   :  { %p2128_p8 = por %p2127_p7, %p2126_p6 }
  0x31   :  { %p2129_p9 = pnand %p2128_p8, %p2122_p5 }
  0x33   :  { %2132 = shalt.err (!%p2129_p9)
}
  0x34   :  { %s2258_s3 = smov 128   ;;  %s2259_s15 = smov 8  }
  0x35   :  { %86 = dma.hbm_to_vmem [thread:$0]  %s2705_s5, 256, %s81_s18, [#allocation12], %s2258_s3, %s2258_s3, %s2259_s15  }
  0x36   :  { %s2260_s19 = smov [#allocation2]   ;;  %s2261_s21 = smov [#allocation7]  }
  0x37   :  { %s23_s20 = sshll.u32 %s2260_s19, 4  ;;  %s44_s22 = sshll.u32 %s2261_s21, 4  ;;  %s24_s20 = int_to_ptr.vmem [resolvable:$true] %s23_s20  ;;  %s45_s22 = int_to_ptr.vmem [resolvable:$true] %s44_s22 }
  0x38   :  { %s2133_s26 = scalar_lea.hbm %s2700_s0, 128 }
  0x39   :  { %p2134_p10 = scmp.ne.s32.totalorder %s2700_s0, %s2133_s26  ;;  %p2137_p11 = scmp.lt.u32.totalorder %s2133_s26, %s2700_s0 }
  0x3b   :  { %p2139_p12 = pnand %p2137_p11, %p2134_p10 }
  0x3d   :  { %2142 = shalt.err (!%p2139_p12)
}
  0x3e   :  { %s2143_s5 = scalar_lea.vmem %s24_s20, 128  ;;  %p2148_p0 = scmp.lt.s32.totalorder %s24_s20, %s24_s20 }
  0x3f   :  { %p2144_p13 = scmp.ne.s32.totalorder %s24_s20, %s2143_s5  ;;  %p2149_p1 = scmp.lt.s32.totalorder %s2143_s5, %s2143_s5 }
  0x41   :  { %p2150_p2 = por %p2149_p1, %p2148_p0 }
  0x43   :  { %p2151_p3 = pnand %p2150_p2, %p2144_p13 }
  0x45   :  { %2154 = shalt.err (!%p2151_p3)
}
  0x46   :  { %26 = dma.hbm_to_vmem [thread:$0]  %s2700_s0, 128, %s24_s20, [#allocation3]  }
  0x47   :  { %s2155_s9 = scalar_lea.hbm %s2702_s2, 512 }
  0x48   :  { %p2156_p4 = scmp.ne.s32.totalorder %s2702_s2, %s2155_s9  ;;  %p2159_p5 = scmp.lt.u32.totalorder %s2155_s9, %s2702_s2 }
  0x4a   :  { %p2161_p6 = pnand %p2159_p5, %p2156_p4 }
  0x4c   :  { %2164 = shalt.err (!%p2161_p6)
}
  0x4d   :  { %s2165_s16 = scalar_lea.vmem %s45_s22, 512  ;;  %p2170_p8 = scmp.lt.s32.totalorder %s45_s22, %s45_s22 }
  0x4e   :  { %p2166_p7 = scmp.ne.s32.totalorder %s45_s22, %s2165_s16  ;;  %p2171_p9 = scmp.lt.s32.totalorder %s2165_s16, %s2165_s16 }
  0x50   :  { %p2172_p10 = por %p2171_p9, %p2170_p8 }
  0x52   :  { %p2173_p11 = pnand %p2172_p10, %p2166_p7 }
  0x54   :  { %2176 = shalt.err (!%p2173_p11)
}
  0x55   :  { %50 = dma.hbm_to_vmem [thread:$0]  %s2702_s2, 512, %s45_s22, [#allocation6], %s2254_s11, %s2254_s11, %s2255_s12  }
  0x56   :  { %s2262_s19 = smov [#allocation10]   ;;  %s2263_s21 = smov [#allocation13]  }
  0x57   :  { %s68_s20 = sshll.u32 %s2262_s19, 4  ;;  %s92_s23 = sshll.u32 %s2263_s21, 4  ;;  %s69_s20 = int_to_ptr.vmem [resolvable:$true] %s68_s20  ;;  %s93_s23 = int_to_ptr.vmem [resolvable:$true] %s92_s23 }
  0x58   :  { %s2177_s1 = scalar_lea.hbm %s2704_s4, 1024 }
  0x59   :  { %p2178_p12 = scmp.ne.s32.totalorder %s2704_s4, %s2177_s1  ;;  %p2181_p13 = scmp.lt.u32.totalorder %s2177_s1, %s2704_s4 }
  0x5b   :  { %p2183_p0 = pnand %p2181_p13, %p2178_p12 }
  0x5d   :  { %2186 = shalt.err (!%p2183_p0)
}
  0x5e   :  { %s2187_s2 = scalar_lea.vmem %s69_s20, 1024  ;;  %p2192_p2 = scmp.lt.s32.totalorder %s69_s20, %s69_s20 }
  0x5f   :  { %p2188_p1 = scmp.ne.s32.totalorder %s69_s20, %s2187_s2  ;;  %p2193_p3 = scmp.lt.s32.totalorder %s2187_s2, %s2187_s2 }
  0x61   :  { %p2194_p4 = por %p2193_p3, %p2192_p2 }
  0x63   :  { %p2195_p5 = pnand %p2194_p4, %p2188_p1 }
  0x65   :  { %2198 = shalt.err (!%p2195_p5)
}
  0x66   :  { %74 = dma.hbm_to_vmem [thread:$0]  %s2704_s4, 1024, %s69_s20, [#allocation9], %s2254_s11, %s2254_s11, %s2255_s12  }
  0x67   :  { %s2199_s8 = scalar_lea.hbm %s2706_s6, 32 }
  0x68   :  { %p2200_p6 = scmp.ne.s32.totalorder %s2706_s6, %s2199_s8  ;;  %p2203_p7 = scmp.lt.u32.totalorder %s2199_s8, %s2706_s6 }
  0x6a   :  { %p2205_p8 = pnand %p2203_p7, %p2200_p6 }
  0x6c   :  { %2208 = shalt.err (!%p2205_p8)
}
  0x6d   :  { %s2209_s3 = scalar_lea.vmem %s93_s23, 32  ;;  %p2214_p10 = scmp.lt.s32.totalorder %s93_s23, %s93_s23 }
  0x6e   :  { %p2210_p9 = scmp.ne.s32.totalorder %s93_s23, %s2209_s3  ;;  %p2215_p11 = scmp.lt.s32.totalorder %s2209_s3, %s2209_s3 }
  0x70   :  { %p2216_p12 = por %p2215_p11, %p2214_p10 }
  0x72   :  { %p2217_p13 = pnand %p2216_p12, %p2210_p9 }
  0x74   :  { %2220 = shalt.err (!%p2217_p13)
}
  0x75   :  { %s2264_s4 = smov 16   ;;  %s2265_s12 = smov 1  }
  0x76   :  { %98 = dma.hbm_to_vmem [thread:$0]  %s2706_s6, 32, %s93_s23, [#allocation12], %s2264_s4, %s2264_s4, %s2265_s12  }
  0x77   :  { %2243 = dma.done.wait [#allocation3], 128  }
  0x78   :  { %2244 = vsyncadd [#allocation3], 4294967168 }
  0x79   :  { %2245 = dma.done.wait [#allocation6], 1024  }
  0x7a   :  { %2246 = vsyncadd [#allocation6], 4294966272 }
  0x7b   :  { %2247 = dma.done.wait [#allocation9], 1536  }
  0x7c   :  { %2248 = vsyncadd [#allocation9], 4294965760 }
  0x7d   :  { %2249 = dma.done.wait [#allocation12], 288  }
  0x7e   :  { %2250 = vsyncadd [#allocation12], 4294967008  ;;  %v2266_v0 = vmov 0.0   ;;  %vm2267_vm0 = vmmov 0   ;;  %v2007_v1 = vld [vmem:[#allocation5] sm:$0xff]   ;;  %v2008_v2 = vld [vmem:[#allocation5 + $0x8] sm:$0xff]  }
  0x7f   :  { %1812 = vmatprep.subr.bf16.mxu1 %v2266_v0  ;;  %1816 = vmatprep.mubr.msk.bf16.mxu1 %vm2267_vm0, %v2266_v0  ;;  %v2425_v3 = vld [vmem:[#allocation2] sm:$0xff]  ;;  %vm157_vm1 = vcmask 261120   ;;  %s2268_s6 = smov 120   ;;  %s2269_s17 = smov 96   ;;  %vm205_vm2 = vcmask 64512   ;;  %vm269_vm3 = vcmask 1043456  }
  0x80   :  { %1826 = vmatprep.subr.bf16.mxu0 %v2266_v0  ;;  %1828 = vmatprep.mubr.msk.bf16.mxu0 %vm2267_vm0, %v2266_v0  ;;  %v122_v4 = vpack.c.bf16 %v2425_v3, %v2425_v3  ;;  %s2270_s19 = smov 80   ;;  %s2271_s20 = smov 88   ;;  %vm656_vm4 = vcmask 130048   ;;  %vm658_vm5 = vcmask 195584   ;;  %vm837_vm6 = vcmask 523264  }
  0x81   :  { %1813 = vmatpush3.bf16.msra.mxu1 %v2007_v1  ;;  %s2272_s21 = smov 72   ;;  %s2273_s23 = smov 112  }
  0x82   :  { %1814 = vmatprep.subr.bf16.mxu1 %v2266_v0  ;;  %s2274_s24 = smov 104   ;;  %s2275_s26 = smov 56  }
  0x83   :  { %s2276_s1 = smov 40   ;;  %s2277_s25 = smov 48  }
  0x84   :  { %s2278_s27 = smov 24  }
  0x85   :  { %1815 = vmatpush3.bf16.msra.mxu1 %v2008_v2 }
  0x86   :  { %1820 = vmatprep.subr.bf16.mxu1 %v2266_v0 }
  0x88   :  { %1817 = vmatmul.mubr.msk.bf16.vlgmr.msra.gmra.mrb[0].mxu1 %vm157_vm1, %v122_v4 }
  0x89   :  { %1822 = vmatprep.mubr.msk.bf16.mxu1 %vm2267_vm0, %v2266_v0 }
 0x15b   :  { %v195_v5 = vpop.f32.mrb[0].mxu1 }
 0x15c   :  { %v2434_v6 = vpack.c.bf16 %v195_v5, %v195_v5  ;;  %v1818_v7 = vpop.f32.mrb[1].mxu1 }
 0x15d   :  { %v198_v8 = vpop.f32.mrb[2].mxu1 }
 0x15e   :  { %313 = vrot.lane.b32.xlu1 %v2434_v6, %s2268_s6  ;;  %203 = vrot.lane.b32.xlu0 %v2434_v6, %s2269_s17  ;;  %v1819_v9 = vpop.f32.mrb[3].mxu1 }
 0x162   :  { %425 = vrot.lane.b32.xlu1 %v2434_v6, %s2270_s19  ;;  %315 = vrot.lane.b32.xlu0 %v2434_v6, %s2271_s20 }
 0x166   :  { %535 = vrot.lane.b32.xlu1 %v2434_v6, %s2272_s21  ;;  %423 = vrot.lane.b32.xlu0 %v2434_v6, %s2273_s23 }
 0x16a   :  { %533 = vrot.lane.b32.xlu0 %v2434_v6, %s2274_s24 }
 0x1d0   :  { %v204_v10 = vpop.permute.xlu0 %203  ;;  %v314_v13 = vpop.permute.xlu1 %313 }
 0x1d1   :  { %v210_v11 = vsel %vm205_vm2, %v204_v10, 0 }
 0x1d2   :  { %1821 = vmatpush3.bf16.xpose.msra.mxu1 %v210_v11 }
 0x1d3   :  { %1832 = vmatprep.subr.bf16.mxu1 %v2266_v0 }
 0x1d4   :  { %v316_v12 = vpop.permute.xlu0 %315  ;;  %v426_v15 = vpop.permute.xlu1 %425 }
 0x1d5   :  { %v321_v14 = vsel %vm205_vm2, %v316_v12, 0  ;;  %v431_v16 = vsel %vm205_vm2, %v426_v15, 0 }
 0x1d8   :  { %v536_v17 = vpop.permute.xlu1 %535  ;;  %v424_v18 = vpop.permute.xlu0 %423 }
 0x1d9   :  { %1823 = vmatmul.mubr.msk.bf16.vlgmr.msra.gmra.mrb[4].mxu1 %vm205_vm2, %v2434_v6  ;;  %v541_v19 = vsel %vm205_vm2, %v536_v17, 0 }
 0x1da   :  { %1833 = vmatpush3.bf16.xpose.msra.mxu1 %v321_v14  ;;  %1834 = vmatprep.mubr.msk.bf16.mxu1 %vm2267_vm0, %v2266_v0 }
 0x1db   :  { %1844 = vmatprep.subr.bf16.mxu1 %v2266_v0 }
 0x1dc   :  { %v534_v20 = vpop.permute.xlu0 %533 }
 0x1e1   :  { %1835 = vmatmul.mubr.msk.bf16.vlgmr.msra.gmra.mrb[8].mxu1 %vm205_vm2, %v314_v13 }
 0x1e2   :  { %1845 = vmatpush3.bf16.xpose.msra.mxu1 %v431_v16  ;;  %1846 = vmatprep.mubr.msk.bf16.mxu1 %vm2267_vm0, %v2266_v0 }
 0x1e3   :  { %1856 = vmatprep.subr.bf16.mxu1 %v2266_v0 }
 0x1e9   :  { %1847 = vmatmul.mubr.msk.bf16.vlgmr.msra.gmra.mrb[12].mxu1 %vm205_vm2, %v424_v18 }
 0x1ea   :  { %1857 = vmatpush3.bf16.xpose.msra.mxu1 %v541_v19  ;;  %1858 = vmatprep.mubr.msk.bf16.mxu1 %vm2267_vm0, %v2266_v0 }
 0x1eb   :  { %1868 = vmatprep.subr.bf16.mxu1 %v2266_v0 }
 0x1f1   :  { %1859 = vmatmul.mubr.msk.bf16.vlgmr.msra.gmra.mrb[16].mxu1 %vm205_vm2, %v534_v20 }
 0x1f2   :  { %1872 = vmatprep.mubr.msk.bf16.mxu1 %vm2267_vm0, %v2266_v0 }
 0x2ac   :  { %v246_v21 = vpop.f32.mrb[4].mxu1 }
 0x2ad   :  { %v1824_v22 = vpop.f32.mrb[5].mxu1  ;;  %v252_v23 = vsel %vm205_vm2, %v246_v21, -inf }
 0x2ae   :  { %253 = vmax.xlane.f32.xlu1 %v252_v23  ;;  %v249_v24 = vpop.f32.mrb[6].mxu1 }
 0x2af   :  { %v1825_v25 = vpop.f32.mrb[7].mxu1 }
 0x2b4   :  { %v357_v26 = vpop.f32.mrb[8].mxu1 }
 0x2b5   :  { %v1836_v27 = vpop.f32.mrb[9].mxu1  ;;  %v363_v28 = vsel %vm205_vm2, %v357_v26, -inf }
 0x2b6   :  { %364 = vmax.xlane.f32.xlu0 %v363_v28  ;;  %v360_v29 = vpop.f32.mrb[10].mxu1 }
 0x2b7   :  { %v1837_v30 = vpop.f32.mrb[11].mxu1 }
 0x2bc   :  { %v467_v31 = vpop.f32.mrb[12].mxu1 }
 0x2bd   :  { %v1848_v32 = vpop.f32.mrb[13].mxu1  ;;  %v473_v33 = vsel %vm205_vm2, %v467_v31, -inf }
 0x2be   :  { %474 = vmax.xlane.f32.xlu0 %v473_v33  ;;  %v470_v34 = vpop.f32.mrb[14].mxu1  ;;  %v2010_v32 = vld [vmem:[#allocation7 + $0x8] sm:$0xff]  }
 0x2bf   :  { %v1849_v35 = vpop.f32.mrb[15].mxu1 }
 0x2c4   :  { %v577_v36 = vpop.f32.mrb[16].mxu1 }
 0x2c5   :  { %v1860_v37 = vpop.f32.mrb[17].mxu1  ;;  %v583_v38 = vsel %vm205_vm2, %v577_v36, -inf }
 0x2c6   :  { %584 = vmax.xlane.f32.xlu1 %v583_v38  ;;  %v580_v39 = vpop.f32.mrb[18].mxu1 }
 0x2c7   :  { %v1861_v40 = vpop.f32.mrb[19].mxu1 }
 0x33b   :  { %v254_v41 = vpop.xlane.xlu1 %253 }
 0x33c   :  { %v255_v42 = vsub.f32 %v246_v21, %v254_v41 }
 0x33e   :  { %v256_v43 = vmul.f32 1.442695, %v255_v42 }
 0x340   :  { %2027 = vpow2.f32 %v256_v43 }
 0x343   :  { %v365_v44 = vpop.xlane.xlu0 %364 }
 0x344   :  { %v366_v45 = vsub.f32 %v357_v26, %v365_v44 }
 0x346   :  { %v367_v46 = vmul.f32 1.442695, %v366_v45 }
 0x348   :  { %2029 = vpow2.f32 %v367_v46 }
 0x34a   :  { %v2028_v47 = vpop.eup %2027 }
 0x34b   :  { %v475_v48 = vpop.xlane.xlu0 %474  ;;  %v258_v49 = vsel %vm205_vm2, %v2028_v47, 0.0 }
 0x34c   :  { %v476_v50 = vsub.f32 %v467_v31, %v475_v48  ;;  %259 = vadd.xlane.f32.xlu0 %v258_v49  ;;  %v2009_v31 = vld [vmem:[#allocation7] sm:$0xff]   ;;  %v661_v48 = vlaneseq }
 0x34d   :  { %1869 = vmatpush3.bf16.msra.mxu1 %v2009_v31 }
 0x34e   :  { %v477_v51 = vmul.f32 1.442695, %v476_v50  ;;  %1870 = vmatprep.subr.bf16.mxu1 %v2266_v0  ;;  %v2518_v49 = vshrl.u32 %v661_v48, 7 }
 0x350   :  { %2031 = vpow2.f32 %v477_v51  ;;  %v663_v50 = vsub.s32 0, %v2518_v49  ;;  %v2521_v51 = vld [vmem:[#allocation11] sm:$0x3f]  ;;  %v902_v48 = vsub.s32 5, %v2518_v49 }
 0x351   :  { %1871 = vmatpush3.bf16.msra.mxu1 %v2010_v32 }
 0x352   :  { %v2030_v52 = vpop.eup %2029  ;;  %1884 = vmatprep.subr.bf16.mxu1 %v2266_v0 }
 0x353   :  { %v369_v53 = vsel %vm205_vm2, %v2030_v52, 0.0  ;;  %v585_v56 = vpop.xlane.xlu1 %584 }
 0x354   :  { %370 = vadd.xlane.f32.xlu1 %v369_v53  ;;  %v586_v57 = vsub.f32 %v577_v36, %v585_v56 }
 0x356   :  { %v587_v58 = vmul.f32 1.442695, %v586_v57 }
 0x358   :  { %2033 = vpow2.f32 %v587_v58 }
 0x35a   :  { %v2032_v54 = vpop.eup %2031 }
 0x35b   :  { %v479_v55 = vsel %vm205_vm2, %v2032_v54, 0.0 }
 0x35c   :  { %480 = vadd.xlane.f32.xlu0 %v479_v55 }
 0x362   :  { %v2034_v59 = vpop.eup %2033 }
 0x363   :  { %v589_v60 = vsel %vm205_vm2, %v2034_v59, 0.0 }
 0x365   :  { %375 = vrot.lane.b32.xlu1 %v2434_v6, %s2275_s26 }
 0x372   :  { %264 = vrot.lane.b32.xlu0 %v2434_v6, %s2254_s11 }
 0x376   :  { %595 = vrot.lane.b32.xlu0 %v2434_v6, %s2276_s1 }
 0x389   :  { %590 = vadd.xlane.f32.xlu1 %v589_v60 }
 0x39a   :  { %485 = vrot.lane.b32.xlu1 %v2434_v6, %s2277_s25 }
 0x3d9   :  { %v260_v61 = vpop.xlane.xlu0 %259 }
 0x3da   :  { %2035 = vrcp.f32 %v260_v61 }
 0x3e1   :  { %v371_v62 = vpop.xlane.xlu1 %370 }
 0x3e2   :  { %2037 = vrcp.f32 %v371_v62 }
 0x3e4   :  { %v2036_v63 = vpop.eup %2035 }
 0x3e5   :  { %v262_v2 = vmul.f32 %v2036_v63, %v2028_v47  ;;  %v376_v7 = vpop.permute.xlu1 %375 }
 0x3e6   :  { %v381_v10 = vsel %vm269_vm3, %v376_v7, 0 }
 0x3e7   :  { %v263_v8 = vpack.c.bf16 %v262_v2, %v262_v2  ;;  %v2011_v2 = vld [vmem:[#allocation8] sm:$0xff]  }
 0x3e9   :  { %v481_v1 = vpop.xlane.xlu0 %480 }
 0x3ea   :  { %2039 = vrcp.f32 %v481_v1 }
 0x3ec   :  { %v2038_v9 = vpop.eup %2037 }
 0x3ed   :  { %v265_v4 = vpop.permute.xlu0 %264  ;;  %v373_v6 = vmul.f32 %v2038_v9, %v2030_v52  ;;  %v664_v52 = vrot.slane %v2521_v51, %v663_v50 }
 0x3ee   :  { %v271_v5 = vsel %vm269_vm3, %v265_v4, 0  ;;  %v2012_v4 = vld [vmem:[#allocation8 + $0x8] sm:$0xff]  }
 0x3ef   :  { %1827 = vmatpush3.bf16.msra.mxu0 %v271_v5  ;;  %v374_v11 = vpack.c.bf16 %v373_v6, %v373_v6  ;;  %v2013_v5 = vld [vmem:[#allocation10] sm:$0xff]   ;;  %v742_v6 = vsub.s32 2, %v2518_v49 }
 0x3f0   :  { %1838 = vmatprep.subr.bf16.mxu0 %v2266_v0 }
 0x3f1   :  { %v596_v17 = vpop.permute.xlu0 %595 }
 0x3f2   :  { %1829 = vmatmul.mubr.msk.bf16.vlgmr.msra.gmra.mrb[0].mxu0 %vm205_vm2, %v263_v8  ;;  %v601_v19 = vsel %vm269_vm3, %v596_v17, 0 }
 0x3f3   :  { %1839 = vmatpush3.bf16.msra.mxu0 %v381_v10  ;;  %1840 = vmatprep.mubr.msk.bf16.mxu0 %vm2267_vm0, %v2266_v0  ;;  %v737_v10 = vsub.s32 1, %v2518_v49 }
 0x3f4   :  { %1850 = vmatprep.subr.bf16.mxu0 %v2266_v0  ;;  %v2040_v12 = vpop.eup %2039 }
 0x3f5   :  { %v483_v14 = vmul.f32 %v2040_v12, %v2032_v54 }
 0x3f7   :  { %v484_v18 = vpack.c.bf16 %v483_v14, %v483_v14  ;;  %v743_v14 = vrot.slane %v2521_v51, %v742_v6 }
 0x3fa   :  { %1841 = vmatmul.mubr.msk.bf16.vlgmr.msra.gmra.mrb[4].mxu0 %vm205_vm2, %v374_v11  ;;  %v738_v11 = vrot.slane %v2521_v51, %v737_v10 }
 0x3fb   :  { %1852 = vmatprep.mubr.msk.bf16.mxu0 %vm2267_vm0, %v2266_v0 }
 0x416   :  { %v591_v13 = vpop.xlane.xlu1 %590 }
 0x417   :  { %2041 = vrcp.f32 %v591_v13 }
 0x41a   :  { %v486_v15 = vpop.permute.xlu1 %485 }
 0x41b   :  { %v491_v16 = vsel %vm269_vm3, %v486_v15, 0 }
 0x41c   :  { %1851 = vmatpush3.bf16.msra.mxu0 %v491_v16 }
 0x41d   :  { %1862 = vmatprep.subr.bf16.mxu0 %v2266_v0 }
 0x41f   :  { %1853 = vmatmul.mubr.msk.bf16.vlgmr.msra.gmra.mrb[8].mxu0 %vm205_vm2, %v484_v18  ;;  %v2015_v18 = vld [vmem:[#allocation10 + $0x10] sm:$0xff]  }
 0x420   :  { %1863 = vmatpush3.bf16.msra.mxu0 %v601_v19  ;;  %1864 = vmatprep.mubr.msk.bf16.mxu0 %vm2267_vm0, %v2266_v0  ;;  %v2016_v19 = vld [vmem:[#allocation10 + $0x18] sm:$0xff]  }
 0x421   :  { %v2042_v20 = vpop.eup %2041  ;;  %1876 = vmatprep.subr.bf16.mxu0 %v2266_v0 }
 0x422   :  { %v593_v21 = vmul.f32 %v2042_v20, %v2034_v59  ;;  %v1720_v20 = vld [vmem:[#allocation13] ss:$0 sm:$0xff] }
 0x424   :  { %v594_v22 = vpack.c.bf16 %v593_v21, %v593_v21 }
 0x427   :  { %1865 = vmatmul.mubr.msk.bf16.vlgmr.msra.gmra.mrb[12].mxu0 %vm205_vm2, %v594_v22 }
 0x428   :  { %1880 = vmatprep.mubr.msk.bf16.mxu0 %vm2267_vm0, %v2266_v0  ;;  %1877 = vmatpush3.bf16.msra.mxu0 %v2011_v2 }
 0x429   :  { %1878 = vmatprep.subr.bf16.mxu0 %v2266_v0 }
 0x42c   :  { %1879 = vmatpush3.bf16.msra.mxu0 %v2012_v4 }
 0x42d   :  { %1896 = vmatprep.subr.bf16.mxu0 %v2266_v0 }
 0x4c5   :  { %v307_v23 = vpop.f32.mrb[0].mxu0 }
 0x4c6   :  { %v1830_v24 = vpop.f32.mrb[1].mxu0 }
 0x4c7   :  { %v310_v25 = vpop.f32.mrb[2].mxu0 }
 0x4c8   :  { %v1831_v26 = vpop.f32.mrb[3].mxu0 }
 0x4cd   :  { %v417_v27 = vpop.f32.mrb[4].mxu0 }
 0x4ce   :  { %644 = vrot.lane.b32.xlu1 %v417_v27, %s2259_s15  ;;  %v1842_v28 = vpop.f32.mrb[5].mxu0 }
 0x4cf   :  { %v420_v29 = vpop.f32.mrb[6].mxu0  ;;  %v811_v28 = vsub.s32 3, %v2518_v49 }
 0x4d0   :  { %v1843_v30 = vpop.f32.mrb[7].mxu0 }
 0x4d1   :  { %v812_v29 = vrot.slane %v2521_v51, %v811_v28 }
 0x4f2   :  { %v527_v33 = vpop.f32.mrb[8].mxu0 }
 0x4f3   :  { %648 = vrot.lane.b32.xlu0 %v527_v33, %s2264_s4  ;;  %v1854_v34 = vpop.f32.mrb[9].mxu0 }
 0x4f4   :  { %v530_v35 = vpop.f32.mrb[10].mxu0 }
 0x4f5   :  { %v1855_v36 = vpop.f32.mrb[11].mxu0 }
 0x4fa   :  { %v637_v37 = vpop.f32.mrb[12].mxu0 }
 0x4fb   :  { %652 = vrot.lane.b32.xlu1 %v637_v37, %s2278_s27  ;;  %v1866_v38 = vpop.f32.mrb[13].mxu0 }
 0x4fc   :  { %v640_v39 = vpop.f32.mrb[14].mxu0 }
 0x4fd   :  { %v1867_v40 = vpop.f32.mrb[15].mxu0 }
 0x540   :  { %v645_v41 = vpop.permute.xlu1 %644 }
 0x541   :  { %v655_v43 = vsel %vm205_vm2, %v307_v23, %v645_v41 }
 0x565   :  { %v649_v42 = vpop.permute.xlu0 %648 }
 0x566   :  { %v657_v44 = vsel %vm656_vm4, %v655_v43, %v649_v42  ;;  %v2017_v42 = vld [vmem:[#allocation5 + $0x10] sm:$0xff]   ;;  %v2018_v43 = vld [vmem:[#allocation5 + $0x18] sm:$0xff]  }
 0x56d   :  { %v653_v45 = vpop.permute.xlu1 %652 }
 0x56e   :  { %v659_v46 = vsel %vm658_vm5, %v657_v44, %v653_v45 }
 0x56f   :  { %v660_v47 = vpack.c.bf16 %v659_v46, %v659_v46 }
 0x571   :  { %1873 = vmatmul.mubr.msk.bf16.vlgmr.msra.gmra.mrb[20].mxu1 %vm157_vm1, %v660_v47  ;;  %v897_v47 = vsub.s32 4, %v2518_v49 }
 0x572   :  { %1892 = vmatprep.mubr.msk.bf16.mxu1 %vm2267_vm0, %v2266_v0  ;;  %1885 = vmatpush3.bf16.msra.mxu1 %v2013_v5 }
 0x573   :  { %1886 = vmatprep.subr.bf16.mxu1 %v2266_v0 }
 0x644   :  { %v714_v53 = vpop.f32.mrb[20].mxu1 }
 0x645   :  { %v715_v54 = vadd.f32 %v714_v53, %v664_v52  ;;  %v1874_v55 = vpop.f32.mrb[21].mxu1  ;;  %v898_v52 = vrot.slane %v2521_v51, %v897_v47 }
 0x646   :  { %v717_v56 = vpop.f32.mrb[22].mxu1  ;;  %v903_v55 = vrot.slane %v2521_v51, %v902_v48 }
 0x647   :  { %v1875_v57 = vpop.f32.mrb[23].mxu1  ;;  %v720_v58 = vadd.f32 %v715_v54, %v2425_v3  ;;  %v2014_v3 = vld [vmem:[#allocation10 + $0x8] sm:$0xff]  }
 0x648   :  { %1887 = vmatpush3.bf16.msra.mxu1 %v2014_v3 }
 0x649   :  { %v721_v59 = vsel %vm157_vm1, %v720_v58, 0.0  ;;  %1888 = vmatprep.subr.bf16.mxu1 %v2266_v0 }
 0x64a   :  { %722 = vadd.xlane.f32.xlu0 %v721_v59 }
 0x64c   :  { %1889 = vmatpush3.bf16.msra.mxu1 %v2015_v18 }
 0x64d   :  { %1890 = vmatprep.subr.bf16.mxu1 %v2266_v0 }
 0x650   :  { %1891 = vmatpush3.bf16.msra.mxu1 %v2016_v19 }
 0x651   :  { %1910 = vmatprep.subr.bf16.mxu1 %v2266_v0 }
 0x6d7   :  { %v723_v60 = vpop.xlane.xlu0 %722 }
 0x6d8   :  { %v725_v61 = vmul.f32 0.03125, %v723_v60 }
 0x6da   :  { %v726_v62 = vsub.f32 %v720_v58, %v725_v61 }
 0x6dc   :  { %v727_v63 = vmul.f32 %v726_v62, %v726_v62 }
 0x6de   :  { %v728_v1 = vsel %vm157_vm1, %v727_v63, 0.0 }
 0x6df   :  { %729 = vadd.xlane.f32.xlu1 %v728_v1 }
 0x76c   :  { %v730_v7 = vpop.xlane.xlu1 %729 }
 0x76d   :  { %v731_v8 = vmul.f32 0.03125, %v730_v7 }
 0x76f   :  { %v732_v9 = vadd.f32 1e-05, %v731_v8 }
 0x771   :  { %2043 = vrsqrt.f32 %v732_v9 }
 0x77b   :  { %v2044_v12 = vpop.eup %2043 }
 0x77c   :  { %v734_v13 = vmul.f32 %v2044_v12, %v726_v62 }
 0x77e   :  { %v739_v15 = vmul.f32 %v738_v11, %v734_v13 }
 0x780   :  { %v744_v16 = vadd.f32 %v743_v14, %v739_v15 }
 0x782   :  { %v745_v17 = vpack.c.bf16 %v744_v16, %v744_v16 }
 0x784   :  { %1881 = vmatmul.mubr.msk.bf16.vlgmr.msra.gmra.mrb[16].mxu0 %vm157_vm1, %v745_v17 }
 0x785   :  { %1900 = vmatprep.mubr.msk.bf16.mxu0 %vm2267_vm0, %v2266_v0  ;;  %1897 = vmatpush3.bf16.msra.mxu0 %v2017_v42 }
 0x786   :  { %1898 = vmatprep.subr.bf16.mxu0 %v2266_v0 }
 0x789   :  { %1899 = vmatpush3.bf16.msra.mxu0 %v2018_v43 }
 0x78a   :  { %1904 = vmatprep.subr.bf16.mxu0 %v2266_v0 }
 0x857   :  { %v801_v21 = vpop.f32.mrb[16].mxu0 }
 0x858   :  { %v802_v22 = vadd.f32 %v1720_v20, %v801_v21  ;;  %v1882_v23 = vpop.f32.mrb[17].mxu0 }
 0x859   :  { %v804_v24 = vpop.f32.mrb[18].mxu0 }
 0x85a   :  { %v807_v25 = vmax.f32 %v802_v22, 0.0  ;;  %v1883_v26 = vpop.f32.mrb[19].mxu0 }
 0x85c   :  { %v808_v27 = vpack.c.bf16 %v807_v25, %v807_v25 }
 0x85e   :  { %1893 = vmatmul.mubr.msk.bf16.vlgmr.msra.gmra.mrb[24].mxu1 %vm837_vm6, %v808_v27 }
 0x85f   :  { %1912 = vmatprep.mubr.msk.bf16.mxu1 %vm2267_vm0, %v2266_v0 }
 0x931   :  { %v875_v30 = vpop.f32.mrb[24].mxu1 }
 0x932   :  { %v876_v31 = vadd.f32 %v875_v30, %v812_v29  ;;  %v1894_v32 = vpop.f32.mrb[25].mxu1 }
 0x933   :  { %v878_v33 = vpop.f32.mrb[26].mxu1 }
 0x934   :  { %v1895_v34 = vpop.f32.mrb[27].mxu1  ;;  %v881_v35 = vadd.f32 %v876_v31, %v744_v16 }
 0x936   :  { %v882_v36 = vsel %vm157_vm1, %v881_v35, 0.0 }
 0x937   :  { %883 = vadd.xlane.f32.xlu0 %v882_v36 }
 0x9c4   :  { %v884_v37 = vpop.xlane.xlu0 %883 }
 0x9c5   :  { %v885_v38 = vmul.f32 0.03125, %v884_v37 }
 0x9c7   :  { %v886_v39 = vsub.f32 %v881_v35, %v885_v38 }
 0x9c9   :  { %v887_v40 = vmul.f32 %v886_v39, %v886_v39 }
 0x9cb   :  { %v888_v41 = vsel %vm157_vm1, %v887_v40, 0.0 }
 0x9cc   :  { %889 = vadd.xlane.f32.xlu0 %v888_v41 }
 0xa59   :  { %v890_v44 = vpop.xlane.xlu0 %889 }
 0xa5a   :  { %v891_v45 = vmul.f32 0.03125, %v890_v44 }
 0xa5c   :  { %v892_v46 = vadd.f32 1e-05, %v891_v45 }
 0xa5e   :  { %2045 = vrsqrt.f32 %v892_v46 }
 0xa68   :  { %v2046_v53 = vpop.eup %2045 }
 0xa69   :  { %v894_v54 = vmul.f32 %v2046_v53, %v886_v39 }
 0xa6b   :  { %v899_v56 = vmul.f32 %v898_v52, %v894_v54 }
 0xa6d   :  { %v2565_v57 = vadd.f32 %v903_v55, %v899_v56 }
 0xa6f   :  { %v905_v58 = vpack.c.bf16 %v2565_v57, %v2565_v57 }
 0xa71   :  { %1901 = vmatmul.mubr.msk.bf16.vlgmr.msra.gmra.mrb[20].mxu0 %vm157_vm1, %v905_v58 }
 0xa72   :  { %1906 = vmatprep.mubr.msk.bf16.mxu0 %vm2267_vm0, %v2266_v0 }
 0xb44   :  { %v983_v59 = vpop.f32.mrb[20].mxu0 }
 0xb45   :  { %v2572_v60 = vpack.c.bf16 %v983_v59, %v983_v59  ;;  %v1902_v61 = vpop.f32.mrb[21].mxu0 }
 0xb46   :  { %v986_v62 = vpop.f32.mrb[22].mxu0 }
 0xb47   :  { %1101 = vrot.lane.b32.xlu0 %v2572_v60, %s2271_s20  ;;  %991 = vrot.lane.b32.xlu1 %v2572_v60, %s2269_s17  ;;  %v1903_v51 = vpop.f32.mrb[23].mxu0 }
 0xb4b   :  { %1209 = vrot.lane.b32.xlu0 %v2572_v60, %s2273_s23  ;;  %1099 = vrot.lane.b32.xlu1 %v2572_v60, %s2268_s6 }
 0xb4f   :  { %1319 = vrot.lane.b32.xlu0 %v2572_v60, %s2274_s24  ;;  %1211 = vrot.lane.b32.xlu1 %v2572_v60, %s2270_s19 }
 0xb53   :  { %1321 = vrot.lane.b32.xlu1 %v2572_v60, %s2272_s21 }
 0xbb9   :  { %v992_v63 = vpop.permute.xlu1 %991  ;;  %v1102_v2 = vpop.permute.xlu0 %1101 }
 0xbba   :  { %v997_v1 = vsel %vm205_vm2, %v992_v63, 0  ;;  %v1107_v5 = vsel %vm205_vm2, %v1102_v2, 0 }
 0xbbb   :  { %1905 = vmatpush3.bf16.xpose.msra.mxu0 %v997_v1 }
 0xbbc   :  { %1916 = vmatprep.subr.bf16.mxu0 %v2266_v0 }
 0xbbd   :  { %v1100_v4 = vpop.permute.xlu1 %1099  ;;  %v1210_v9 = vpop.permute.xlu0 %1209 }
 0xbc1   :  { %v1212_v3 = vpop.permute.xlu1 %1211  ;;  %v1320_v12 = vpop.permute.xlu0 %1319 }
 0xbc2   :  { %1907 = vmatmul.mubr.msk.bf16.vlgmr.msra.gmra.mrb[24].mxu0 %vm205_vm2, %v2572_v60  ;;  %v1217_v7 = vsel %vm205_vm2, %v1212_v3, 0 }
 0xbc3   :  { %1917 = vmatpush3.bf16.xpose.msra.mxu0 %v1107_v5  ;;  %1918 = vmatprep.mubr.msk.bf16.mxu0 %vm2267_vm0, %v2266_v0 }
 0xbc4   :  { %1928 = vmatprep.subr.bf16.mxu0 %v2266_v0 }
 0xbc5   :  { %v1322_v8 = vpop.permute.xlu1 %1321 }
 0xbc6   :  { %v1327_v11 = vsel %vm205_vm2, %v1322_v8, 0 }
 0xbca   :  { %1919 = vmatmul.mubr.msk.bf16.vlgmr.msra.gmra.mrb[28].mxu0 %vm205_vm2, %v1100_v4 }
 0xbcb   :  { %1929 = vmatpush3.bf16.xpose.msra.mxu0 %v1217_v7  ;;  %1930 = vmatprep.mubr.msk.bf16.mxu0 %vm2267_vm0, %v2266_v0 }
 0xbcc   :  { %1940 = vmatprep.subr.bf16.mxu0 %v2266_v0 }
 0xbd2   :  { %1931 = vmatmul.mubr.msk.bf16.vlgmr.msra.gmra.mrb[32].mxu0 %vm205_vm2, %v1210_v9 }
 0xbd3   :  { %1941 = vmatpush3.bf16.xpose.msra.mxu0 %v1327_v11  ;;  %1942 = vmatprep.mubr.msk.bf16.mxu0 %vm2267_vm0, %v2266_v0 }
 0xbd4   :  { %1952 = vmatprep.subr.bf16.mxu0 %v2266_v0 }
 0xbda   :  { %1943 = vmatmul.mubr.msk.bf16.vlgmr.msra.gmra.mrb[36].mxu0 %vm205_vm2, %v1320_v12 }
 0xbdb   :  { %1956 = vmatprep.mubr.msk.bf16.mxu0 %vm2267_vm0, %v2266_v0 }
 0xc95   :  { %v1033_v13 = vpop.f32.mrb[24].mxu0 }
 0xc96   :  { %v1908_v14 = vpop.f32.mrb[25].mxu0  ;;  %v1039_v15 = vsel %vm205_vm2, %v1033_v13, -inf }
 0xc97   :  { %1040 = vmax.xlane.f32.xlu1 %v1039_v15  ;;  %v1036_v16 = vpop.f32.mrb[26].mxu0 }
 0xc98   :  { %v1909_v17 = vpop.f32.mrb[27].mxu0 }
 0xc9d   :  { %v1143_v18 = vpop.f32.mrb[28].mxu0 }
 0xc9e   :  { %v1920_v19 = vpop.f32.mrb[29].mxu0  ;;  %v1149_v20 = vsel %vm205_vm2, %v1143_v18, -inf }
 0xc9f   :  { %1150 = vmax.xlane.f32.xlu0 %v1149_v20  ;;  %v1146_v21 = vpop.f32.mrb[30].mxu0 }
 0xca0   :  { %v1921_v22 = vpop.f32.mrb[31].mxu0 }
 0xca5   :  { %v1253_v23 = vpop.f32.mrb[32].mxu0 }
 0xca6   :  { %v1932_v24 = vpop.f32.mrb[33].mxu0  ;;  %v1259_v25 = vsel %vm205_vm2, %v1253_v23, -inf }
 0xca7   :  { %1260 = vmax.xlane.f32.xlu0 %v1259_v25  ;;  %v1256_v26 = vpop.f32.mrb[34].mxu0 }
 0xca8   :  { %v1933_v27 = vpop.f32.mrb[35].mxu0 }
 0xcad   :  { %v1363_v29 = vpop.f32.mrb[36].mxu0 }
 0xcae   :  { %v1944_v30 = vpop.f32.mrb[37].mxu0  ;;  %v1369_v31 = vsel %vm205_vm2, %v1363_v29, -inf }
 0xcaf   :  { %1370 = vmax.xlane.f32.xlu1 %v1369_v31  ;;  %v1366_v32 = vpop.f32.mrb[38].mxu0  ;;  %v2019_v31 = vld [vmem:[#allocation7 + $0x10] sm:$0xff]  }
 0xcb0   :  { %v1945_v33 = vpop.f32.mrb[39].mxu0  ;;  %1953 = vmatpush3.bf16.msra.mxu0 %v2019_v31  ;;  %v2020_v32 = vld [vmem:[#allocation7 + $0x18] sm:$0xff]  }
 0xcb1   :  { %1954 = vmatprep.subr.bf16.mxu0 %v2266_v0 }
 0xcb4   :  { %1955 = vmatpush3.bf16.msra.mxu0 %v2020_v32 }
 0xcb5   :  { %1968 = vmatprep.subr.bf16.mxu0 %v2266_v0 }
 0xd24   :  { %v1041_v34 = vpop.xlane.xlu1 %1040 }
 0xd25   :  { %v1042_v35 = vsub.f32 %v1033_v13, %v1041_v34 }
 0xd27   :  { %v1043_v36 = vmul.f32 1.442695, %v1042_v35 }
 0xd29   :  { %2047 = vpow2.f32 %v1043_v36 }
 0xd2c   :  { %v1151_v37 = vpop.xlane.xlu0 %1150 }
 0xd2d   :  { %v1152_v38 = vsub.f32 %v1143_v18, %v1151_v37 }
 0xd2f   :  { %v1153_v39 = vmul.f32 1.442695, %v1152_v38 }
 0xd31   :  { %2049 = vpow2.f32 %v1153_v39 }
 0xd33   :  { %v2048_v40 = vpop.eup %2047 }
 0xd34   :  { %v1261_v41 = vpop.xlane.xlu0 %1260  ;;  %v1045_v42 = vsel %vm205_vm2, %v2048_v40, 0.0 }
 0xd35   :  { %v1262_v43 = vsub.f32 %v1253_v23, %v1261_v41  ;;  %1046 = vadd.xlane.f32.xlu0 %v1045_v42 }
 0xd37   :  { %v1263_v44 = vmul.f32 1.442695, %v1262_v43 }
 0xd39   :  { %2051 = vpow2.f32 %v1263_v44 }
 0xd3b   :  { %v2050_v45 = vpop.eup %2049 }
 0xd3c   :  { %v1155_v46 = vsel %vm205_vm2, %v2050_v45, 0.0  ;;  %v1371_v54 = vpop.xlane.xlu1 %1370 }
 0xd3d   :  { %1156 = vadd.xlane.f32.xlu1 %v1155_v46  ;;  %v1372_v55 = vsub.f32 %v1363_v29, %v1371_v54 }
 0xd3f   :  { %v1373_v56 = vmul.f32 1.442695, %v1372_v55 }
 0xd41   :  { %2053 = vpow2.f32 %v1373_v56 }
 0xd43   :  { %v2052_v52 = vpop.eup %2051 }
 0xd44   :  { %v1265_v53 = vsel %vm205_vm2, %v2052_v52, 0.0 }
 0xd45   :  { %1266 = vadd.xlane.f32.xlu0 %v1265_v53  ;;  %v2656_v53 = vld [vmem:[#allocation11 + $0x8] sm:$0x3f] }
 0xd46   :  { %v1448_v54 = vrot.slane %v2656_v53, %v663_v50  ;;  %v2022_v50 = vld [vmem:[#allocation8 + $0x18] sm:$0xff]  }
 0xd4b   :  { %v2054_v58 = vpop.eup %2053 }
 0xd4c   :  { %v1375_v59 = vsel %vm205_vm2, %v2054_v58, 0.0 }
 0xd4e   :  { %1161 = vrot.lane.b32.xlu1 %v2572_v60, %s2275_s26 }
 0xd5b   :  { %1051 = vrot.lane.b32.xlu0 %v2572_v60, %s2254_s11  ;;  %s2279_s11 = smov [#allocation14]  }
 0xd5f   :  { %1381 = vrot.lane.b32.xlu0 %v2572_v60, %s2276_s1 }
 0xd72   :  { %1376 = vadd.xlane.f32.xlu1 %v1375_v59 }
 0xd83   :  { %1271 = vrot.lane.b32.xlu1 %v2572_v60, %s2277_s25 }
 0xdc2   :  { %v1047_v61 = vpop.xlane.xlu0 %1046 }
 0xdc3   :  { %2055 = vrcp.f32 %v1047_v61 }
 0xdca   :  { %v1157_v62 = vpop.xlane.xlu1 %1156 }
 0xdcb   :  { %2057 = vrcp.f32 %v1157_v62 }
 0xdcd   :  { %v2056_v51 = vpop.eup %2055 }
 0xdce   :  { %v1049_v1 = vmul.f32 %v2056_v51, %v2048_v40  ;;  %v1162_v5 = vpop.permute.xlu1 %1161 }
 0xdcf   :  { %v1167_v8 = vsel %vm269_vm3, %v1162_v5, 0 }
 0xdd0   :  { %v1050_v3 = vpack.c.bf16 %v1049_v1, %v1049_v1 }
 0xdd2   :  { %v1267_v63 = vpop.xlane.xlu0 %1266 }
 0xdd3   :  { %2059 = vrcp.f32 %v1267_v63 }
 0xdd5   :  { %v2058_v7 = vpop.eup %2057 }
 0xdd6   :  { %v1052_v2 = vpop.permute.xlu0 %1051  ;;  %v1159_v60 = vmul.f32 %v2058_v7, %v2050_v45  ;;  %v2023_v7 = vld [vmem:[#allocation10 + $0x20] sm:$0xff]  }
 0xdd7   :  { %v1057_v4 = vsel %vm269_vm3, %v1052_v2, 0 }
 0xdd8   :  { %1911 = vmatpush3.bf16.msra.mxu1 %v1057_v4  ;;  %v1160_v9 = vpack.c.bf16 %v1159_v60, %v1159_v60 }
 0xdd9   :  { %1922 = vmatprep.subr.bf16.mxu1 %v2266_v0 }
 0xdda   :  { %v1382_v16 = vpop.permute.xlu0 %1381 }
 0xddb   :  { %1913 = vmatmul.mubr.msk.bf16.vlgmr.msra.gmra.mrb[28].mxu1 %vm205_vm2, %v1050_v3  ;;  %v1387_v18 = vsel %vm269_vm3, %v1382_v16, 0  ;;  %v2021_v3 = vld [vmem:[#allocation8 + $0x10] sm:$0xff]  }
 0xddc   :  { %1923 = vmatpush3.bf16.msra.mxu1 %v1167_v8  ;;  %1924 = vmatprep.mubr.msk.bf16.mxu1 %vm2267_vm0, %v2266_v0  ;;  %v2024_v8 = vld [vmem:[#allocation10 + $0x28] sm:$0xff]  }
 0xddd   :  { %1934 = vmatprep.subr.bf16.mxu1 %v2266_v0  ;;  %v2060_v11 = vpop.eup %2059 }
 0xdde   :  { %v1269_v13 = vmul.f32 %v2060_v11, %v2052_v52  ;;  %v1521_v11 = vrot.slane %v2656_v53, %v737_v10 }
 0xde0   :  { %v1270_v17 = vpack.c.bf16 %v1269_v13, %v1269_v13 }
 0xde3   :  { %1925 = vmatmul.mubr.msk.bf16.vlgmr.msra.gmra.mrb[32].mxu1 %vm205_vm2, %v1160_v9 }
 0xde4   :  { %1936 = vmatprep.mubr.msk.bf16.mxu1 %vm2267_vm0, %v2266_v0 }
 0xdff   :  { %v1377_v12 = vpop.xlane.xlu1 %1376 }
 0xe00   :  { %2061 = vrcp.f32 %v1377_v12 }
 0xe03   :  { %v1272_v14 = vpop.permute.xlu1 %1271 }
 0xe04   :  { %v1277_v15 = vsel %vm269_vm3, %v1272_v14, 0  ;;  %v1526_v14 = vrot.slane %v2656_v53, %v742_v6  ;;  %v1595_v6 = vrot.slane %v2656_v53, %v811_v28  ;;  %v1680_v28 = vrot.slane %v2656_v53, %v897_v47 }
 0xe05   :  { %1935 = vmatpush3.bf16.msra.mxu1 %v1277_v15 }
 0xe06   :  { %1946 = vmatprep.subr.bf16.mxu1 %v2266_v0 }
 0xe08   :  { %1937 = vmatmul.mubr.msk.bf16.vlgmr.msra.gmra.mrb[36].mxu1 %vm205_vm2, %v1270_v17 }
 0xe09   :  { %1947 = vmatpush3.bf16.msra.mxu1 %v1387_v18  ;;  %1948 = vmatprep.mubr.msk.bf16.mxu1 %vm2267_vm0, %v2266_v0  ;;  %v2025_v18 = vld [vmem:[#allocation10 + $0x30] sm:$0xff]  }
 0xe0a   :  { %v2062_v19 = vpop.eup %2061  ;;  %1960 = vmatprep.subr.bf16.mxu1 %v2266_v0 }
 0xe0b   :  { %v1379_v20 = vmul.f32 %v2062_v19, %v2054_v58  ;;  %v2026_v19 = vld [vmem:[#allocation10 + $0x38] sm:$0xff]  }
 0xe0d   :  { %v1380_v21 = vpack.c.bf16 %v1379_v20, %v1379_v20  ;;  %v1743_v20 = vld [vmem:[#allocation13 + $0x1] ss:$0 sm:$0xff] }
 0xe10   :  { %1949 = vmatmul.mubr.msk.bf16.vlgmr.msra.gmra.mrb[40].mxu1 %vm205_vm2, %v1380_v21 }
 0xe11   :  { %1964 = vmatprep.mubr.msk.bf16.mxu1 %vm2267_vm0, %v2266_v0  ;;  %1961 = vmatpush3.bf16.msra.mxu1 %v2021_v3 }
 0xe12   :  { %1962 = vmatprep.subr.bf16.mxu1 %v2266_v0 }
 0xe15   :  { %1963 = vmatpush3.bf16.msra.mxu1 %v2022_v50 }
 0xeae   :  { %v1093_v22 = vpop.f32.mrb[28].mxu1 }
 0xeaf   :  { %v1914_v23 = vpop.f32.mrb[29].mxu1 }
 0xeb0   :  { %v1096_v24 = vpop.f32.mrb[30].mxu1 }
 0xeb1   :  { %v1915_v25 = vpop.f32.mrb[31].mxu1 }
 0xeb6   :  { %v1203_v26 = vpop.f32.mrb[32].mxu1 }
 0xeb7   :  { %1430 = vrot.lane.b32.xlu1 %v1203_v26, %s2259_s15  ;;  %v1926_v27 = vpop.f32.mrb[33].mxu1  ;;  %s1694_s15 = sshll.u32 %s2279_s11, 4  ;;  %s1695_s15 = int_to_ptr.vmem [resolvable:$true] %s1694_s15 }
 0xeb8   :  { %v1206_v29 = vpop.f32.mrb[34].mxu1  ;;  %s2221_s28 = scalar_lea.vmem %s1695_s15, 128  ;;  %p2226_p1 = scmp.lt.s32.totalorder %s1695_s15, %s1695_s15 }
 0xeb9   :  { %v1927_v30 = vpop.f32.mrb[35].mxu1  ;;  %p2222_p0 = scmp.ne.s32.totalorder %s1695_s15, %s2221_s28  ;;  %p2227_p2 = scmp.lt.s32.totalorder %s2221_s28, %s2221_s28 }
 0xebb   :  { %p2228_p3 = por %p2227_p2, %p2226_p1 }
 0xebd   :  { %p2229_p4 = pnand %p2228_p3, %p2222_p0 }
 0xedb   :  { %v1313_v33 = vpop.f32.mrb[36].mxu1 }
 0xedc   :  { %1434 = vrot.lane.b32.xlu0 %v1313_v33, %s2264_s4  ;;  %v1938_v34 = vpop.f32.mrb[37].mxu1 }
 0xedd   :  { %v1316_v35 = vpop.f32.mrb[38].mxu1 }
 0xede   :  { %v1939_v36 = vpop.f32.mrb[39].mxu1 }
 0xee3   :  { %v1423_v37 = vpop.f32.mrb[40].mxu1 }
 0xee4   :  { %1438 = vrot.lane.b32.xlu1 %v1423_v37, %s2278_s27  ;;  %v1950_v38 = vpop.f32.mrb[41].mxu1 }
 0xee5   :  { %v1426_v39 = vpop.f32.mrb[42].mxu1 }
 0xee6   :  { %v1951_v40 = vpop.f32.mrb[43].mxu1 }
 0xf29   :  { %v1431_v41 = vpop.permute.xlu1 %1430 }
 0xf2a   :  { %v1441_v43 = vsel %vm205_vm2, %v1093_v22, %v1431_v41 }
 0xf4e   :  { %v1435_v42 = vpop.permute.xlu0 %1434 }
 0xf4f   :  { %v1442_v44 = vsel %vm656_vm4, %v1441_v43, %v1435_v42 }
 0xf56   :  { %v1439_v45 = vpop.permute.xlu1 %1438 }
 0xf57   :  { %v1443_v46 = vsel %vm658_vm5, %v1442_v44, %v1439_v45  ;;  %v1685_v44 = vrot.slane %v2656_v53, %v902_v48 }
 0xf58   :  { %v1444_v52 = vpack.c.bf16 %v1443_v46, %v1443_v46 }
 0xf5a   :  { %1957 = vmatmul.mubr.msk.bf16.vlgmr.msra.gmra.mrb[40].mxu0 %vm157_vm1, %v1444_v52 }
 0xf5b   :  { %1976 = vmatprep.mubr.msk.bf16.mxu0 %vm2267_vm0, %v2266_v0  ;;  %1969 = vmatpush3.bf16.msra.mxu0 %v2023_v7 }
 0xf5c   :  { %1970 = vmatprep.subr.bf16.mxu0 %v2266_v0 }
 0xf5f   :  { %1971 = vmatpush3.bf16.msra.mxu0 %v2024_v8 }
 0xf60   :  { %1972 = vmatprep.subr.bf16.mxu0 %v2266_v0 }
 0xf63   :  { %1973 = vmatpush3.bf16.msra.mxu0 %v2025_v18 }
 0xf64   :  { %1974 = vmatprep.subr.bf16.mxu0 %v2266_v0 }
 0xf67   :  { %1975 = vmatpush3.bf16.msra.mxu0 %v2026_v19 }
0x102d   :  { %v1498_v55 = vpop.f32.mrb[40].mxu0 }
0x102e   :  { %v1499_v56 = vadd.f32 %v1498_v55, %v1448_v54  ;;  %v1958_v58 = vpop.f32.mrb[41].mxu0 }
0x102f   :  { %v1501_v59 = vpop.f32.mrb[42].mxu0 }
0x1030   :  { %v1959_v61 = vpop.f32.mrb[43].mxu0  ;;  %v1504_v62 = vadd.f32 %v1499_v56, %v2565_v57 }
0x1032   :  { %v1505_v51 = vsel %vm157_vm1, %v1504_v62, 0.0 }
0x1033   :  { %1506 = vadd.xlane.f32.xlu0 %v1505_v51 }
0x10c0   :  { %v1507_v63 = vpop.xlane.xlu0 %1506 }
0x10c1   :  { %v1508_v1 = vmul.f32 0.03125, %v1507_v63 }
0x10c3   :  { %v1509_v2 = vsub.f32 %v1504_v62, %v1508_v1 }
0x10c5   :  { %v1510_v4 = vmul.f32 %v1509_v2, %v1509_v2 }
0x10c7   :  { %v1511_v5 = vsel %vm157_vm1, %v1510_v4, 0.0 }
0x10c8   :  { %1512 = vadd.xlane.f32.xlu1 %v1511_v5 }
0x1155   :  { %v1513_v57 = vpop.xlane.xlu1 %1512 }
0x1156   :  { %v1514_v60 = vmul.f32 0.03125, %v1513_v57 }
0x1158   :  { %v1515_v9 = vadd.f32 1e-05, %v1514_v60 }
0x115a   :  { %2063 = vrsqrt.f32 %v1515_v9 }
0x1164   :  { %v2064_v12 = vpop.eup %2063 }
0x1165   :  { %v1517_v13 = vmul.f32 %v2064_v12, %v1509_v2 }
0x1167   :  { %v1522_v15 = vmul.f32 %v1521_v11, %v1517_v13 }
0x1169   :  { %v1527_v16 = vadd.f32 %v1526_v14, %v1522_v15 }
0x116b   :  { %v1528_v17 = vpack.c.bf16 %v1527_v16, %v1527_v16 }
0x116d   :  { %1965 = vmatmul.mubr.msk.bf16.vlgmr.msra.gmra.mrb[44].mxu1 %vm157_vm1, %v1528_v17 }
0x1240   :  { %v1584_v21 = vpop.f32.mrb[44].mxu1 }
0x1241   :  { %v1585_v10 = vadd.f32 %v1743_v20, %v1584_v21  ;;  %v1966_v22 = vpop.f32.mrb[45].mxu1 }
0x1242   :  { %v1587_v23 = vpop.f32.mrb[46].mxu1 }
0x1243   :  { %v1590_v24 = vmax.f32 %v1585_v10, 0.0  ;;  %v1967_v25 = vpop.f32.mrb[47].mxu1 }
0x1245   :  { %v1591_v26 = vpack.c.bf16 %v1590_v24, %v1590_v24 }
0x1247   :  { %1977 = vmatmul.mubr.msk.bf16.vlgmr.msra.gmra.mrb[44].mxu0 %vm837_vm6, %v1591_v26 }
0x131a   :  { %v1657_v27 = vpop.f32.mrb[44].mxu0 }
0x131b   :  { %v1658_v29 = vadd.f32 %v1657_v27, %v1595_v6  ;;  %v1978_v30 = vpop.f32.mrb[45].mxu0 }
0x131c   :  { %v1660_v0 = vpop.f32.mrb[46].mxu0 }
0x131d   :  { %v1979_v31 = vpop.f32.mrb[47].mxu0  ;;  %v1663_v32 = vadd.f32 %v1658_v29, %v1527_v16 }
0x131f   :  { %v1664_v33 = vsel %vm157_vm1, %v1663_v32, 0.0 }
0x1320   :  { %1665 = vadd.xlane.f32.xlu0 %v1664_v33 }
0x13ad   :  { %v1666_v34 = vpop.xlane.xlu0 %1665 }
0x13ae   :  { %v1667_v35 = vmul.f32 0.03125, %v1666_v34 }
0x13b0   :  { %v1668_v36 = vsub.f32 %v1663_v32, %v1667_v35 }
0x13b2   :  { %v1669_v37 = vmul.f32 %v1668_v36, %v1668_v36 }
0x13b4   :  { %v1670_v38 = vsel %vm157_vm1, %v1669_v37, 0.0 }
0x13b5   :  { %1671 = vadd.xlane.f32.xlu0 %v1670_v38 }
0x1442   :  { %v1672_v39 = vpop.xlane.xlu0 %1671 }
0x1443   :  { %v1673_v40 = vmul.f32 0.03125, %v1672_v39 }
0x1445   :  { %v1674_v41 = vadd.f32 1e-05, %v1673_v40 }
0x1447   :  { %2065 = vrsqrt.f32 %v1674_v41 }
0x1451   :  { %v2066_v42 = vpop.eup %2065 }
0x1452   :  { %v1676_v43 = vmul.f32 %v2066_v42, %v1668_v36 }
0x1454   :  { %v1681_v45 = vmul.f32 %v1680_v28, %v1676_v43 }
0x1456   :  { %v1686_v46 = vadd.f32 %v1685_v44, %v1681_v45 }
0x1458   :  { %1687 = vst.msk [vmem:[#allocation14] sm:$0xff] %vm157_vm1, %v1686_v46 }
0x1459   :  { %2232 = shalt.err (!%p2229_p4)
}
0x145a   :  { %s2233_s22 = scalar_lea.hbm %s2707_s7, 128 }
0x145b   :  { %p2234_p5 = scmp.ne.s32.totalorder %s2707_s7, %s2233_s22  ;;  %p2237_p6 = scmp.lt.u32.totalorder %s2233_s22, %s2707_s7 }
0x145d   :  { %p2239_p7 = pnand %p2237_p6, %p2234_p5 }
0x145f   :  { %2242 = shalt.err (!%p2239_p7)
}
0x1460   :  { %1697 = dma.vmem_to_hbm [thread:$0]  %s1695_s15, 128, %s2707_s7, [#allocation4]  }
0x1461   :  { %2251 = dma.done.wait [#allocation4], 128  }
0x1462   :  { %2252 = vsyncadd [#allocation4], 4294967168 }
0x1463   :  { %1701 = vsyncpa [#allocation3], 1 }
0x1464   :  { %1702 = vsyncpa [#allocation6], 1 }
0x1465   :  { %1703 = vsyncpa [#allocation9], 1 }
0x1466   :  { %1704 = vsyncpa [#allocation12], 1 }
0x1467   :  { %1705 = vsyncpa [#allocation4], 1 }

</bundles_post_ra>
